<compile_context>
chip_gen: v7x
topology: tpu7x:2x2x1
jax: 0.10.0
libtpu: 0.0.40
codegen_flags: <defaults>
</compile_context>

<pallas_src>
import jax
import jax.numpy as jnp
from jax.experimental import pallas as pl
from jax.experimental.pallas import tpu as pltpu


# ---------------------------------------------------------------------------
# Weight plumbing (trace-time, outside the kernel).
#
# Gate-column layout of the fused 8H-wide gate vector (H = hidden per direction):
#   [ i_f | i_b | f_f | f_b | g_f | g_b | o_f | o_b ]        (PyTorch order i,f,g,o)
# State layout (B, 2H): [ h_f | h_b ],  [ c_f | c_b ].
# ---------------------------------------------------------------------------
def _interleave_gate_cols(wf, wb, h):
    """wf, wb: (K, 4H) -> (K, 8H) with per-gate interleaving [q_f | q_b] per gate q."""
    k = wf.shape[0]
    stacked = jnp.stack([wf.reshape(k, 4, h), wb.reshape(k, 4, h)], axis=2)  # (K,4,2,H)
    return stacked.reshape(k, 8 * h)


# ---------------------------------------------------------------------------
# Fused kernel: embedding gather + bidirectional LSTM recurrence + output slab.
#
# Args (scalar-prefetch, inputs, outputs, scratch):
#   ids_ref   : SMEM (B, S) int32
#   table_ref : VMEM (V, E)        embedding table
#   wih_ref   : VMEM (2E, 8H)      block weights: rows 0:E -> fwd cols, E:2E -> bwd cols
#   whh_ref   : VMEM (2H, 8H)      block weights: rows 0:H -> fwd cols, H:2H -> bwd cols
#   b_ref     : VMEM (1, 8H)       fused bias (b_ih + b_hh), interleaved
#   out_ref   : VMEM (B, S*2H)     lane-dense output slab
#   hn_ref    : VMEM (2B, H)       rows 0:B fwd final h, B:2B bwd final h
#   cn_ref    : VMEM (2B, H)
#   x_scr     : VMEM (S*B, 2E)     per-step inputs: [x_t | x_{S-1-t}] per row block
# ---------------------------------------------------------------------------
def _encoder_kernel(ids_ref, table_ref, wih_ref, whh_ref, b_ref,
                    out_ref, hn_ref, cn_ref, x_scr):
    B, S = ids_ref.shape
    E = table_ref.shape[1]
    H2 = whh_ref.shape[0]          # 2 * hidden-per-direction
    H = H2 // 2

    # ---- Embedding gather, fused into the kernel (no HBM round trip). ----------
    # Row block t of x_scr holds [emb(x_t) | emb(x_{S-1-t})]: fwd input in the first
    # E lanes, bwd input in the last E lanes.
    # TODO(synk): for realistic vocab sizes keep the table in HBM (memory_space=pl.ANY)
    # and DMA-gather only the needed rows instead of keeping (V, E) resident in VMEM.
    for t in range(S):
        for b in range(B):
            row = table_ref[pl.ds(ids_ref[b, t], 1), :]                 # (1, E)
            x_scr[pl.ds(t * B + b, 1), pl.ds(0, E)] = row               # fwd at step t
            x_scr[pl.ds((S - 1 - t) * B + b, 1), pl.ds(E, E)] = row     # bwd at step S-1-t

    # ---- Input projection for ALL timesteps + both directions: one wide matmul. --
    # (S*B, 2E) @ (2E, 8H) -> (S*B, 8H); bias folded in once.
    gx = (jnp.dot(x_scr[...], wih_ref[...], preferred_element_type=jnp.float32)
          + b_ref[...])

    whh = whh_ref[...]                                                  # (2H, 8H)

    # ---- Fused fwd+bwd recurrence, fully unrolled over time. --------------------
    h = jnp.zeros((B, H2), jnp.float32)                                 # [h_f | h_b]
    c = jnp.zeros((B, H2), jnp.float32)                                 # [c_f | c_b]
    hs = []
    for t in range(S):
        gates = gx[t * B:(t + 1) * B, :] + jnp.dot(
            h, whh, preferred_element_type=jnp.float32)                 # (B, 8H)
        i_g = jax.nn.sigmoid(gates[:, 0 * H2:1 * H2])                   # [i_f | i_b]
        f_g = jax.nn.sigmoid(gates[:, 1 * H2:2 * H2])                   # [f_f | f_b]
        g_g = jnp.tanh(gates[:, 2 * H2:3 * H2])                         # [g_f | g_b]
        o_g = jax.nn.sigmoid(gates[:, 3 * H2:4 * H2])                   # [o_f | o_b]
        c = f_g * c + i_g * g_g
        h = o_g * jnp.tanh(c)
        hs.append(h)

    # ---- Assemble lane-dense output slab and store it once. ---------------------
    # output[:, time, 0:H]  = fwd hidden at `time`         (= hs[time][:, :H])
    # output[:, time, H:2H] = bwd hidden at `time`         (= hs[S-1-time][:, H:])
    blocks = [jnp.concatenate([hs[t][:, :H], hs[S - 1 - t][:, H:]], axis=1)
              for t in range(S)]
    out_ref[...] = jnp.concatenate(blocks, axis=1)                      # (B, S*2H)

    # Final states (dir 0 = forward, dir 1 = backward), as 2-D (2B, H) slabs.
    hn_ref[...] = jnp.concatenate([h[:, :H], h[:, H:]], axis=0)
    cn_ref[...] = jnp.concatenate([c[:, :H], c[:, H:]], axis=0)


# ---------------------------------------------------------------------------
# EncoderRNN forward.
# ---------------------------------------------------------------------------
@jax.jit
def encoder_rnn_forward(word_ids, params):
    B, S = word_ids.shape
    V, E = params["embedding"].shape
    H = params["w_hh_f"].shape[1]          # hidden per direction
    H2, H8 = 2 * H, 8 * H

    f32 = jnp.float32
    zE = jnp.zeros((E, 4 * H), f32)
    zH = jnp.zeros((H, 4 * H), f32)

    # Block weights: rows that multiply fwd inputs only feed fwd gate columns, etc.
    wih_blk = jnp.concatenate(
        [_interleave_gate_cols(params["w_ih_f"].T.astype(f32), zE, H),
         _interleave_gate_cols(zE, params["w_ih_b"].T.astype(f32), H)], axis=0)   # (2E, 8H)
    whh_blk = jnp.concatenate(
        [_interleave_gate_cols(params["w_hh_f"].T.astype(f32), zH, H),
         _interleave_gate_cols(zH, params["w_hh_b"].T.astype(f32), H)], axis=0)   # (2H, 8H)
    bias = _interleave_gate_cols(
        (params["b_ih_f"] + params["b_hh_f"]).reshape(1, 4 * H).astype(f32),
        (params["b_ih_b"] + params["b_hh_b"]).reshape(1, 4 * H).astype(f32), H)    # (1, 8H)

    ids = word_ids.astype(jnp.int32)
    table = params["embedding"].astype(f32)

    out_slab, hn2, cn2 = pl.pallas_call(
        _encoder_kernel,
        out_shape=(jax.ShapeDtypeStruct((B, S * H2), f32),
                   jax.ShapeDtypeStruct((2 * B, H), f32),
                   jax.ShapeDtypeStruct((2 * B, H), f32)),
        grid_spec=pltpu.PrefetchScalarGridSpec(
            num_scalar_prefetch=1,                 # word ids -> SMEM
            grid=(1,),                             # single step: all work in-kernel
            in_specs=[pl.BlockSpec((V, E), lambda i, sids: (0, 0)),
                      pl.BlockSpec((2 * E, H8), lambda i, sids: (0, 0)),
                      pl.BlockSpec((H2, H8), lambda i, sids: (0, 0)),
                      pl.BlockSpec((1, H8), lambda i, sids: (0, 0))],
            out_specs=(pl.BlockSpec((B, S * H2), lambda i, sids: (0, 0)),
                       pl.BlockSpec((2 * B, H), lambda i, sids: (0, 0)),
                       pl.BlockSpec((2 * B, H), lambda i, sids: (0, 0))),
            scratch_shapes=[pltpu.VMEM((S * B, 2 * E), f32)]),
        compiler_params=pltpu.CompilerParams(
            dimension_semantics=("arbitrary",)),
    )(ids, table, wih_blk, whh_blk, bias)

    output = out_slab.reshape(B, S, H2)            # (B, S, hidden_size)
    hn = hn2.reshape(2, B, H)                      # (2, B, hidden_size // 2)
    cn = cn2.reshape(2, B, H)
    return output, hn, cn


# ---------------------------------------------------------------------------
# Pure-JAX reference (mirrors PyTorch nn.LSTM bidirectional semantics).
# ---------------------------------------------------------------------------
def _ref_lstm_dir(x_seq, w_ih, w_hh, b_ih, b_hh):
    H = w_hh.shape[1]
    B = x_seq.shape[1]

    def step(carry, x_t):
        h, c = carry
        gates = x_t @ w_ih.T + b_ih + h @ w_hh.T + b_hh
        i, f, g, o = jnp.split(gates, 4, axis=-1)
        i, f, o = jax.nn.sigmoid(i), jax.nn.sigmoid(f), jax.nn.sigmoid(o)
        g = jnp.tanh(g)
        c = f * c + i * g
        h = o * jnp.tanh(c)
        return (h, c), h

    init = (jnp.zeros((B, H), jnp.float32), jnp.zeros((B, H), jnp.float32))
    (hn, cn), outs = jax.lax.scan(step, init, x_seq)
    return outs, hn, cn


def _ref_forward(word_ids, params):
    emb = params["embedding"][word_ids]                   # (B, S, E)
    x_seq = jnp.transpose(emb, (1, 0, 2))
    out_f, hn_f, cn_f = _ref_lstm_dir(x_seq, params["w_ih_f"], params["w_hh_f"],
                                      params["b_ih_f"], params["b_hh_f"])
    out_b, hn_b, cn_b = _ref_lstm_dir(x_seq[::-1], params["w_ih_b"],
                                      params["w_hh_b"], params["b_ih_b"],
                                      params["b_hh_b"])
    out_b = out_b[::-1]
    output = jnp.transpose(jnp.concatenate([out_f, out_b], -1), (1, 0, 2))
    return output, jnp.stack([hn_f, hn_b]), jnp.stack([cn_f, cn_b])


# ---------------------------------------------------------------------------
if __name__ == "__main__":
    VOCAB, EMB, HIDDEN = 64, 32, 32          # hidden per direction = 16
    BATCH, SEQ = 2, 8
    H_DIR = HIDDEN // 2

    key = jax.random.PRNGKey(0)
    ks = jax.random.split(key, 10)
    bound = 1.0 / jnp.sqrt(H_DIR)

    params = {
        "embedding": jax.random.normal(ks[0], (VOCAB, EMB), jnp.float32) * 0.1,
        "w_ih_f": jax.random.uniform(ks[1], (4 * H_DIR, EMB), jnp.float32, -bound, bound),
        "w_hh_f": jax.random.uniform(ks[2], (4 * H_DIR, H_DIR), jnp.float32, -bound, bound),
        "b_ih_f": jax.random.uniform(ks[3], (4 * H_DIR,), jnp.float32, -bound, bound),
        "b_hh_f": jax.random.uniform(ks[4], (4 * H_DIR,), jnp.float32, -bound, bound),
        "w_ih_b": jax.random.uniform(ks[5], (4 * H_DIR, EMB), jnp.float32, -bound, bound),
        "w_hh_b": jax.random.uniform(ks[6], (4 * H_DIR, H_DIR), jnp.float32, -bound, bound),
        "b_ih_b": jax.random.uniform(ks[7], (4 * H_DIR,), jnp.float32, -bound, bound),
        "b_hh_b": jax.random.uniform(ks[8], (4 * H_DIR,), jnp.float32, -bound, bound),
    }

    word_ids = jax.random.randint(ks[9], (BATCH, SEQ), 0, VOCAB, dtype=jnp.int32)

    output, hn, cn = encoder_rnn_forward(word_ids, params)
    jax.block_until_ready((output, hn, cn))

    assert output.shape == (BATCH, SEQ, HIDDEN)
    assert hn.shape == (2, BATCH, H_DIR) and cn.shape == (2, BATCH, H_DIR)

    # Correctness check against a pure-JAX reference of the PyTorch module.
    ref_out, ref_hn, ref_cn = _ref_forward(word_ids, params)
    assert jnp.allclose(output, ref_out, atol=1e-5, rtol=1e-5)
    assert jnp.allclose(hn, ref_hn, atol=1e-5, rtol=1e-5)
    assert jnp.allclose(cn, ref_cn, atol=1e-5, rtol=1e-5)

    print("KERNEL_OK")
</pallas_src>

<mosaic_0001>
module attributes {stable_mosaic.version = 11 : i64} {
  func.func @_encoder_kernel(%arg0: i32, %arg1: memref<2x8xi32, #tpu.memory_space<smem>>, %arg2: memref<64x32xf32, #tpu.memory_space<vmem>>, %arg3: memref<64x128xf32, #tpu.memory_space<vmem>>, %arg4: memref<32x128xf32, #tpu.memory_space<vmem>>, %arg5: memref<1x128xf32, #tpu.memory_space<vmem>>, %arg6: memref<2x256xf32, #tpu.memory_space<vmem>>, %arg7: memref<4x16xf32, #tpu.memory_space<vmem>>, %arg8: memref<4x16xf32, #tpu.memory_space<vmem>>, %arg9: memref<16x64xf32, #tpu.memory_space<vmem>>) attributes {dimension_semantics = [#tpu.dimension_semantics<arbitrary>], iteration_bounds = array<i64: 1>, scalar_prefetch = 1 : i64, scratch_operands = 1 : i64, tpu.core_type = #tpu.core_type<tc>, window_params = [{pipeline_mode = #tpu.pipeline_mode<synchronous>, transform_indices = @transform_0, window_bounds = array<i64: 64, 32>}, {pipeline_mode = #tpu.pipeline_mode<synchronous>, transform_indices = @transform_1, window_bounds = array<i64: 64, 128>}, {pipeline_mode = #tpu.pipeline_mode<synchronous>, transform_indices = @transform_2, window_bounds = array<i64: 32, 128>}, {pipeline_mode = #tpu.pipeline_mode<synchronous>, transform_indices = @transform_3, window_bounds = array<i64: 1, 128>}, {pipeline_mode = #tpu.pipeline_mode<synchronous>, transform_indices = @transform_4, window_bounds = array<i64: 2, 256>}, {pipeline_mode = #tpu.pipeline_mode<synchronous>, transform_indices = @transform_5, window_bounds = array<i64: 4, 16>}, {pipeline_mode = #tpu.pipeline_mode<synchronous>, transform_indices = @transform_6, window_bounds = array<i64: 4, 16>}]} {
    %c0 = arith.constant 0 : index
    %c0_0 = arith.constant 0 : index
    %0 = memref.load %arg1[%c0, %c0_0] : memref<2x8xi32, #tpu.memory_space<smem>>
    %1 = arith.index_cast %0 : i32 to index
    %c0_1 = arith.constant 0 : index
    %2 = vector.load %arg2[%1, %c0_1] : memref<64x32xf32, #tpu.memory_space<vmem>>, vector<1x32xf32>
    %c0_2 = arith.constant 0 : index
    %c0_3 = arith.constant 0 : index
    %3 = vector.load %arg9[%c0_2, %c0_3] : memref<16x64xf32, #tpu.memory_space<vmem>>, vector<1x32xf32>
    tpu.vector_store %arg9[%c0_2, %c0_3], %2 {strides = array<i32>} : memref<16x64xf32, #tpu.memory_space<vmem>>, vector<1x32xf32>,
    %c14 = arith.constant 14 : index
    %c32 = arith.constant 32 : index
    %4 = vector.load %arg9[%c14, %c32] : memref<16x64xf32, #tpu.memory_space<vmem>>, vector<1x32xf32>
    tpu.vector_store %arg9[%c14, %c32], %2 {strides = array<i32>} : memref<16x64xf32, #tpu.memory_space<vmem>>, vector<1x32xf32>,
    %c1 = arith.constant 1 : index
    %c0_4 = arith.constant 0 : index
    %5 = memref.load %arg1[%c1, %c0_4] : memref<2x8xi32, #tpu.memory_space<smem>>
    %6 = arith.index_cast %5 : i32 to index
    %c0_5 = arith.constant 0 : index
    %7 = vector.load %arg2[%6, %c0_5] : memref<64x32xf32, #tpu.memory_space<vmem>>, vector<1x32xf32>
    %c1_6 = arith.constant 1 : index
    %c0_7 = arith.constant 0 : index
    %8 = vector.load %arg9[%c1_6, %c0_7] : memref<16x64xf32, #tpu.memory_space<vmem>>, vector<1x32xf32>
    tpu.vector_store %arg9[%c1_6, %c0_7], %7 {strides = array<i32>} : memref<16x64xf32, #tpu.memory_space<vmem>>, vector<1x32xf32>,
    %c15 = arith.constant 15 : index
    %c32_8 = arith.constant 32 : index
    %9 = vector.load %arg9[%c15, %c32_8] : memref<16x64xf32, #tpu.memory_space<vmem>>, vector<1x32xf32>
    tpu.vector_store %arg9[%c15, %c32_8], %7 {strides = array<i32>} : memref<16x64xf32, #tpu.memory_space<vmem>>, vector<1x32xf32>,
    %c0_9 = arith.constant 0 : index
    %c1_10 = arith.constant 1 : index
    %10 = memref.load %arg1[%c0_9, %c1_10] : memref<2x8xi32, #tpu.memory_space<smem>>
    %11 = arith.index_cast %10 : i32 to index
    %c0_11 = arith.constant 0 : index
    %12 = vector.load %arg2[%11, %c0_11] : memref<64x32xf32, #tpu.memory_space<vmem>>, vector<1x32xf32>
    %c2 = arith.constant 2 : index
    %c0_12 = arith.constant 0 : index
    %13 = vector.load %arg9[%c2, %c0_12] : memref<16x64xf32, #tpu.memory_space<vmem>>, vector<1x32xf32>
    tpu.vector_store %arg9[%c2, %c0_12], %12 {strides = array<i32>} : memref<16x64xf32, #tpu.memory_space<vmem>>, vector<1x32xf32>,
    %c12 = arith.constant 12 : index
    %c32_13 = arith.constant 32 : index
    %14 = vector.load %arg9[%c12, %c32_13] : memref<16x64xf32, #tpu.memory_space<vmem>>, vector<1x32xf32>
    tpu.vector_store %arg9[%c12, %c32_13], %12 {strides = array<i32>} : memref<16x64xf32, #tpu.memory_space<vmem>>, vector<1x32xf32>,
    %c1_14 = arith.constant 1 : index
    %c1_15 = arith.constant 1 : index
    %15 = memref.load %arg1[%c1_14, %c1_15] : memref<2x8xi32, #tpu.memory_space<smem>>
    %16 = arith.index_cast %15 : i32 to index
    %c0_16 = arith.constant 0 : index
    %17 = vector.load %arg2[%16, %c0_16] : memref<64x32xf32, #tpu.memory_space<vmem>>, vector<1x32xf32>
    %c3 = arith.constant 3 : index
    %c0_17 = arith.constant 0 : index
    %18 = vector.load %arg9[%c3, %c0_17] : memref<16x64xf32, #tpu.memory_space<vmem>>, vector<1x32xf32>
    tpu.vector_store %arg9[%c3, %c0_17], %17 {strides = array<i32>} : memref<16x64xf32, #tpu.memory_space<vmem>>, vector<1x32xf32>,
    %c13 = arith.constant 13 : index
    %c32_18 = arith.constant 32 : index
    %19 = vector.load %arg9[%c13, %c32_18] : memref<16x64xf32, #tpu.memory_space<vmem>>, vector<1x32xf32>
    tpu.vector_store %arg9[%c13, %c32_18], %17 {strides = array<i32>} : memref<16x64xf32, #tpu.memory_space<vmem>>, vector<1x32xf32>,
    %c0_19 = arith.constant 0 : index
    %c2_20 = arith.constant 2 : index
    %20 = memref.load %arg1[%c0_19, %c2_20] : memref<2x8xi32, #tpu.memory_space<smem>>
    %21 = arith.index_cast %20 : i32 to index
    %c0_21 = arith.constant 0 : index
    %22 = vector.load %arg2[%21, %c0_21] : memref<64x32xf32, #tpu.memory_space<vmem>>, vector<1x32xf32>
    %c4 = arith.constant 4 : index
    %c0_22 = arith.constant 0 : index
    %23 = vector.load %arg9[%c4, %c0_22] : memref<16x64xf32, #tpu.memory_space<vmem>>, vector<1x32xf32>
    tpu.vector_store %arg9[%c4, %c0_22], %22 {strides = array<i32>} : memref<16x64xf32, #tpu.memory_space<vmem>>, vector<1x32xf32>,
    %c10 = arith.constant 10 : index
    %c32_23 = arith.constant 32 : index
    %24 = vector.load %arg9[%c10, %c32_23] : memref<16x64xf32, #tpu.memory_space<vmem>>, vector<1x32xf32>
    tpu.vector_store %arg9[%c10, %c32_23], %22 {strides = array<i32>} : memref<16x64xf32, #tpu.memory_space<vmem>>, vector<1x32xf32>,
    %c1_24 = arith.constant 1 : index
    %c2_25 = arith.constant 2 : index
    %25 = memref.load %arg1[%c1_24, %c2_25] : memref<2x8xi32, #tpu.memory_space<smem>>
    %26 = arith.index_cast %25 : i32 to index
    %c0_26 = arith.constant 0 : index
    %27 = vector.load %arg2[%26, %c0_26] : memref<64x32xf32, #tpu.memory_space<vmem>>, vector<1x32xf32>
    %c5 = arith.constant 5 : index
    %c0_27 = arith.constant 0 : index
    %28 = vector.load %arg9[%c5, %c0_27] : memref<16x64xf32, #tpu.memory_space<vmem>>, vector<1x32xf32>
    tpu.vector_store %arg9[%c5, %c0_27], %27 {strides = array<i32>} : memref<16x64xf32, #tpu.memory_space<vmem>>, vector<1x32xf32>,
    %c11 = arith.constant 11 : index
    %c32_28 = arith.constant 32 : index
    %29 = vector.load %arg9[%c11, %c32_28] : memref<16x64xf32, #tpu.memory_space<vmem>>, vector<1x32xf32>
    tpu.vector_store %arg9[%c11, %c32_28], %27 {strides = array<i32>} : memref<16x64xf32, #tpu.memory_space<vmem>>, vector<1x32xf32>,
    %c0_29 = arith.constant 0 : index
    %c3_30 = arith.constant 3 : index
    %30 = memref.load %arg1[%c0_29, %c3_30] : memref<2x8xi32, #tpu.memory_space<smem>>
    %31 = arith.index_cast %30 : i32 to index
    %c0_31 = arith.constant 0 : index
    %32 = vector.load %arg2[%31, %c0_31] : memref<64x32xf32, #tpu.memory_space<vmem>>, vector<1x32xf32>
    %c6 = arith.constant 6 : index
    %c0_32 = arith.constant 0 : index
    %33 = vector.load %arg9[%c6, %c0_32] : memref<16x64xf32, #tpu.memory_space<vmem>>, vector<1x32xf32>
    tpu.vector_store %arg9[%c6, %c0_32], %32 {strides = array<i32>} : memref<16x64xf32, #tpu.memory_space<vmem>>, vector<1x32xf32>,
    %c8 = arith.constant 8 : index
    %c32_33 = arith.constant 32 : index
    %34 = vector.load %arg9[%c8, %c32_33] : memref<16x64xf32, #tpu.memory_space<vmem>>, vector<1x32xf32>
    tpu.vector_store %arg9[%c8, %c32_33], %32 {strides = array<i32>} : memref<16x64xf32, #tpu.memory_space<vmem>>, vector<1x32xf32>,
    %c1_34 = arith.constant 1 : index
    %c3_35 = arith.constant 3 : index
    %35 = memref.load %arg1[%c1_34, %c3_35] : memref<2x8xi32, #tpu.memory_space<smem>>
    %36 = arith.index_cast %35 : i32 to index
    %c0_36 = arith.constant 0 : index
    %37 = vector.load %arg2[%36, %c0_36] : memref<64x32xf32, #tpu.memory_space<vmem>>, vector<1x32xf32>
    %c7 = arith.constant 7 : index
    %c0_37 = arith.constant 0 : index
    %38 = vector.load %arg9[%c7, %c0_37] : memref<16x64xf32, #tpu.memory_space<vmem>>, vector<1x32xf32>
    tpu.vector_store %arg9[%c7, %c0_37], %37 {strides = array<i32>} : memref<16x64xf32, #tpu.memory_space<vmem>>, vector<1x32xf32>,
    %c9 = arith.constant 9 : index
    %c32_38 = arith.constant 32 : index
    %39 = vector.load %arg9[%c9, %c32_38] : memref<16x64xf32, #tpu.memory_space<vmem>>, vector<1x32xf32>
    tpu.vector_store %arg9[%c9, %c32_38], %37 {strides = array<i32>} : memref<16x64xf32, #tpu.memory_space<vmem>>, vector<1x32xf32>,
    %c0_39 = arith.constant 0 : index
    %c4_40 = arith.constant 4 : index
    %40 = memref.load %arg1[%c0_39, %c4_40] : memref<2x8xi32, #tpu.memory_space<smem>>
    %41 = arith.index_cast %40 : i32 to index
    %c0_41 = arith.constant 0 : index
    %42 = vector.load %arg2[%41, %c0_41] : memref<64x32xf32, #tpu.memory_space<vmem>>, vector<1x32xf32>
    %c8_42 = arith.constant 8 : index
    %c0_43 = arith.constant 0 : index
    %43 = vector.load %arg9[%c8_42, %c0_43] : memref<16x64xf32, #tpu.memory_space<vmem>>, vector<1x32xf32>
    tpu.vector_store %arg9[%c8_42, %c0_43], %42 {strides = array<i32>} : memref<16x64xf32, #tpu.memory_space<vmem>>, vector<1x32xf32>,
    %c6_44 = arith.constant 6 : index
    %c32_45 = arith.constant 32 : index
    %44 = vector.load %arg9[%c6_44, %c32_45] : memref<16x64xf32, #tpu.memory_space<vmem>>, vector<1x32xf32>
    tpu.vector_store %arg9[%c6_44, %c32_45], %42 {strides = array<i32>} : memref<16x64xf32, #tpu.memory_space<vmem>>, vector<1x32xf32>,
    %c1_46 = arith.constant 1 : index
    %c4_47 = arith.constant 4 : index
    %45 = memref.load %arg1[%c1_46, %c4_47] : memref<2x8xi32, #tpu.memory_space<smem>>
    %46 = arith.index_cast %45 : i32 to index
    %c0_48 = arith.constant 0 : index
    %47 = vector.load %arg2[%46, %c0_48] : memref<64x32xf32, #tpu.memory_space<vmem>>, vector<1x32xf32>
    %c9_49 = arith.constant 9 : index
    %c0_50 = arith.constant 0 : index
    %48 = vector.load %arg9[%c9_49, %c0_50] : memref<16x64xf32, #tpu.memory_space<vmem>>, vector<1x32xf32>
    tpu.vector_store %arg9[%c9_49, %c0_50], %47 {strides = array<i32>} : memref<16x64xf32, #tpu.memory_space<vmem>>, vector<1x32xf32>,
    %c7_51 = arith.constant 7 : index
    %c32_52 = arith.constant 32 : index
    %49 = vector.load %arg9[%c7_51, %c32_52] : memref<16x64xf32, #tpu.memory_space<vmem>>, vector<1x32xf32>
    tpu.vector_store %arg9[%c7_51, %c32_52], %47 {strides = array<i32>} : memref<16x64xf32, #tpu.memory_space<vmem>>, vector<1x32xf32>,
    %c0_53 = arith.constant 0 : index
    %c5_54 = arith.constant 5 : index
    %50 = memref.load %arg1[%c0_53, %c5_54] : memref<2x8xi32, #tpu.memory_space<smem>>
    %51 = arith.index_cast %50 : i32 to index
    %c0_55 = arith.constant 0 : index
    %52 = vector.load %arg2[%51, %c0_55] : memref<64x32xf32, #tpu.memory_space<vmem>>, vector<1x32xf32>
    %c10_56 = arith.constant 10 : index
    %c0_57 = arith.constant 0 : index
    %53 = vector.load %arg9[%c10_56, %c0_57] : memref<16x64xf32, #tpu.memory_space<vmem>>, vector<1x32xf32>
    tpu.vector_store %arg9[%c10_56, %c0_57], %52 {strides = array<i32>} : memref<16x64xf32, #tpu.memory_space<vmem>>, vector<1x32xf32>,
    %c4_58 = arith.constant 4 : index
    %c32_59 = arith.constant 32 : index
    %54 = vector.load %arg9[%c4_58, %c32_59] : memref<16x64xf32, #tpu.memory_space<vmem>>, vector<1x32xf32>
    tpu.vector_store %arg9[%c4_58, %c32_59], %52 {strides = array<i32>} : memref<16x64xf32, #tpu.memory_space<vmem>>, vector<1x32xf32>,
    %c1_60 = arith.constant 1 : index
    %c5_61 = arith.constant 5 : index
    %55 = memref.load %arg1[%c1_60, %c5_61] : memref<2x8xi32, #tpu.memory_space<smem>>
    %56 = arith.index_cast %55 : i32 to index
    %c0_62 = arith.constant 0 : index
    %57 = vector.load %arg2[%56, %c0_62] : memref<64x32xf32, #tpu.memory_space<vmem>>, vector<1x32xf32>
    %c11_63 = arith.constant 11 : index
    %c0_64 = arith.constant 0 : index
    %58 = vector.load %arg9[%c11_63, %c0_64] : memref<16x64xf32, #tpu.memory_space<vmem>>, vector<1x32xf32>
    tpu.vector_store %arg9[%c11_63, %c0_64], %57 {strides = array<i32>} : memref<16x64xf32, #tpu.memory_space<vmem>>, vector<1x32xf32>,
    %c5_65 = arith.constant 5 : index
    %c32_66 = arith.constant 32 : index
    %59 = vector.load %arg9[%c5_65, %c32_66] : memref<16x64xf32, #tpu.memory_space<vmem>>, vector<1x32xf32>
    tpu.vector_store %arg9[%c5_65, %c32_66], %57 {strides = array<i32>} : memref<16x64xf32, #tpu.memory_space<vmem>>, vector<1x32xf32>,
    %c0_67 = arith.constant 0 : index
    %c6_68 = arith.constant 6 : index
    %60 = memref.load %arg1[%c0_67, %c6_68] : memref<2x8xi32, #tpu.memory_space<smem>>
    %61 = arith.index_cast %60 : i32 to index
    %c0_69 = arith.constant 0 : index
    %62 = vector.load %arg2[%61, %c0_69] : memref<64x32xf32, #tpu.memory_space<vmem>>, vector<1x32xf32>
    %c12_70 = arith.constant 12 : index
    %c0_71 = arith.constant 0 : index
    %63 = vector.load %arg9[%c12_70, %c0_71] : memref<16x64xf32, #tpu.memory_space<vmem>>, vector<1x32xf32>
    tpu.vector_store %arg9[%c12_70, %c0_71], %62 {strides = array<i32>} : memref<16x64xf32, #tpu.memory_space<vmem>>, vector<1x32xf32>,
    %c2_72 = arith.constant 2 : index
    %c32_73 = arith.constant 32 : index
    %64 = vector.load %arg9[%c2_72, %c32_73] : memref<16x64xf32, #tpu.memory_space<vmem>>, vector<1x32xf32>
    tpu.vector_store %arg9[%c2_72, %c32_73], %62 {strides = array<i32>} : memref<16x64xf32, #tpu.memory_space<vmem>>, vector<1x32xf32>,
    %c1_74 = arith.constant 1 : index
    %c6_75 = arith.constant 6 : index
    %65 = memref.load %arg1[%c1_74, %c6_75] : memref<2x8xi32, #tpu.memory_space<smem>>
    %66 = arith.index_cast %65 : i32 to index
    %c0_76 = arith.constant 0 : index
    %67 = vector.load %arg2[%66, %c0_76] : memref<64x32xf32, #tpu.memory_space<vmem>>, vector<1x32xf32>
    %c13_77 = arith.constant 13 : index
    %c0_78 = arith.constant 0 : index
    %68 = vector.load %arg9[%c13_77, %c0_78] : memref<16x64xf32, #tpu.memory_space<vmem>>, vector<1x32xf32>
    tpu.vector_store %arg9[%c13_77, %c0_78], %67 {strides = array<i32>} : memref<16x64xf32, #tpu.memory_space<vmem>>, vector<1x32xf32>,
    %c3_79 = arith.constant 3 : index
    %c32_80 = arith.constant 32 : index
    %69 = vector.load %arg9[%c3_79, %c32_80] : memref<16x64xf32, #tpu.memory_space<vmem>>, vector<1x32xf32>
    tpu.vector_store %arg9[%c3_79, %c32_80], %67 {strides = array<i32>} : memref<16x64xf32, #tpu.memory_space<vmem>>, vector<1x32xf32>,
    %c0_81 = arith.constant 0 : index
    %c7_82 = arith.constant 7 : index
    %70 = memref.load %arg1[%c0_81, %c7_82] : memref<2x8xi32, #tpu.memory_space<smem>>
    %71 = arith.index_cast %70 : i32 to index
    %c0_83 = arith.constant 0 : index
    %72 = vector.load %arg2[%71, %c0_83] : memref<64x32xf32, #tpu.memory_space<vmem>>, vector<1x32xf32>
    %c14_84 = arith.constant 14 : index
    %c0_85 = arith.constant 0 : index
    %73 = vector.load %arg9[%c14_84, %c0_85] : memref<16x64xf32, #tpu.memory_space<vmem>>, vector<1x32xf32>
    tpu.vector_store %arg9[%c14_84, %c0_85], %72 {strides = array<i32>} : memref<16x64xf32, #tpu.memory_space<vmem>>, vector<1x32xf32>,
    %c0_86 = arith.constant 0 : index
    %c32_87 = arith.constant 32 : index
    %74 = vector.load %arg9[%c0_86, %c32_87] : memref<16x64xf32, #tpu.memory_space<vmem>>, vector<1x32xf32>
    tpu.vector_store %arg9[%c0_86, %c32_87], %72 {strides = array<i32>} : memref<16x64xf32, #tpu.memory_space<vmem>>, vector<1x32xf32>,
    %c1_88 = arith.constant 1 : index
    %c7_89 = arith.constant 7 : index
    %75 = memref.load %arg1[%c1_88, %c7_89] : memref<2x8xi32, #tpu.memory_space<smem>>
    %76 = arith.index_cast %75 : i32 to index
    %c0_90 = arith.constant 0 : index
    %77 = vector.load %arg2[%76, %c0_90] : memref<64x32xf32, #tpu.memory_space<vmem>>, vector<1x32xf32>
    %c15_91 = arith.constant 15 : index
    %c0_92 = arith.constant 0 : index
    %78 = vector.load %arg9[%c15_91, %c0_92] : memref<16x64xf32, #tpu.memory_space<vmem>>, vector<1x32xf32>
    tpu.vector_store %arg9[%c15_91, %c0_92], %77 {strides = array<i32>} : memref<16x64xf32, #tpu.memory_space<vmem>>, vector<1x32xf32>,
    %c1_93 = arith.constant 1 : index
    %c32_94 = arith.constant 32 : index
    %79 = vector.load %arg9[%c1_93, %c32_94] : memref<16x64xf32, #tpu.memory_space<vmem>>, vector<1x32xf32>
    tpu.vector_store %arg9[%c1_93, %c32_94], %77 {strides = array<i32>} : memref<16x64xf32, #tpu.memory_space<vmem>>, vector<1x32xf32>,
    %c0_95 = arith.constant 0 : index
    %c0_96 = arith.constant 0 : index
    %80 = vector.load %arg9[%c0_95, %c0_96] : memref<16x64xf32, #tpu.memory_space<vmem>>, vector<16x64xf32>
    %c0_97 = arith.constant 0 : index
    %c0_98 = arith.constant 0 : index
    %81 = vector.load %arg3[%c0_97, %c0_98] : memref<64x128xf32, #tpu.memory_space<vmem>>, vector<64x128xf32>
    %cst = arith.constant dense<0.000000e+00> : vector<16x128xf32>
    %82 = tpu.matmul %80, %81, %cst {dimension_numbers = #tpu.dot_dimension_numbers<[1], [0], [0], [1], [0, 0, 1, 1], [], []>} : vector<16x64xf32>, vector<64x128xf32>, vector<16x128xf32> -> vector<16x128xf32>
    %c0_99 = arith.constant 0 : index
    %c0_100 = arith.constant 0 : index
    %83 = vector.load %arg5[%c0_99, %c0_100] : memref<1x128xf32, #tpu.memory_space<vmem>>, vector<1x128xf32>
    %84 = vector.broadcast %83 : vector<1x128xf32> to vector<16x128xf32>
    %85 = arith.addf %82, %84 : vector<16x128xf32>
    %c0_101 = arith.constant 0 : index
    %c0_102 = arith.constant 0 : index
    %86 = vector.load %arg4[%c0_101, %c0_102] : memref<32x128xf32, #tpu.memory_space<vmem>>, vector<32x128xf32>
    %cst_103 = arith.constant 0.000000e+00 : f32
    %87 = vector.broadcast %cst_103 : f32 to vector<2x32xf32>
    %cst_104 = arith.constant 0.000000e+00 : f32
    %88 = vector.broadcast %cst_104 : f32 to vector<2x32xf32>
    %89 = vector.extract_strided_slice %85 {offsets = [0, 0], sizes = [2, 128], strides = [1, 1]} : vector<16x128xf32> to vector<2x128xf32>
    %cst_105 = arith.constant dense<0.000000e+00> : vector<2x128xf32>
    %90 = tpu.matmul %87, %86, %cst_105 {dimension_numbers = #tpu.dot_dimension_numbers<[1], [0], [0], [1], [0, 0, 1, 1], [], []>} : vector<2x32xf32>, vector<32x128xf32>, vector<2x128xf32> -> vector<2x128xf32>
    %91 = arith.addf %89, %90 : vector<2x128xf32>
    %92 = vector.extract_strided_slice %91 {offsets = [0, 0], sizes = [2, 32], strides = [1, 1]} : vector<2x128xf32> to vector<2x32xf32>
    %93 = arith.negf %92 : vector<2x32xf32>
    %94 = math.exp %93 : vector<2x32xf32>
    %cst_106 = arith.constant 1.000000e+00 : f32
    %95 = vector.broadcast %cst_106 : f32 to vector<2x32xf32>
    %96 = arith.addf %95, %94 : vector<2x32xf32>
    %97 = arith.divf %95, %96 : vector<2x32xf32>
    %98 = vector.extract_strided_slice %91 {offsets = [0, 32], sizes = [2, 32], strides = [1, 1]} : vector<2x128xf32> to vector<2x32xf32>
    %99 = arith.negf %98 : vector<2x32xf32>
    %100 = math.exp %99 : vector<2x32xf32>
    %cst_107 = arith.constant 1.000000e+00 : f32
    %101 = vector.broadcast %cst_107 : f32 to vector<2x32xf32>
    %102 = arith.addf %101, %100 : vector<2x32xf32>
    %103 = arith.divf %101, %102 : vector<2x32xf32>
    %104 = vector.extract_strided_slice %91 {offsets = [0, 64], sizes = [2, 32], strides = [1, 1]} : vector<2x128xf32> to vector<2x32xf32>
    %105 = math.tanh %104 : vector<2x32xf32>
    %106 = vector.extract_strided_slice %91 {offsets = [0, 96], sizes = [2, 32], strides = [1, 1]} : vector<2x128xf32> to vector<2x32xf32>
    %107 = arith.negf %106 : vector<2x32xf32>
    %108 = math.exp %107 : vector<2x32xf32>
    %cst_108 = arith.constant 1.000000e+00 : f32
    %109 = vector.broadcast %cst_108 : f32 to vector<2x32xf32>
    %110 = arith.addf %109, %108 : vector<2x32xf32>
    %111 = arith.divf %109, %110 : vector<2x32xf32>
    %112 = arith.mulf %103, %88 : vector<2x32xf32>
    %113 = arith.mulf %97, %105 : vector<2x32xf32>
    %114 = arith.addf %112, %113 : vector<2x32xf32>
    %115 = math.tanh %114 : vector<2x32xf32>
    %116 = arith.mulf %111, %115 : vector<2x32xf32>
    %117 = vector.extract_strided_slice %85 {offsets = [2, 0], sizes = [2, 128], strides = [1, 1]} : vector<16x128xf32> to vector<2x128xf32>
    %cst_109 = arith.constant dense<0.000000e+00> : vector<2x128xf32>
    %118 = tpu.matmul %116, %86, %cst_109 {dimension_numbers = #tpu.dot_dimension_numbers<[1], [0], [0], [1], [0, 0, 1, 1], [], []>} : vector<2x32xf32>, vector<32x128xf32>, vector<2x128xf32> -> vector<2x128xf32>
    %119 = arith.addf %117, %118 : vector<2x128xf32>
    %120 = vector.extract_strided_slice %119 {offsets = [0, 0], sizes = [2, 32], strides = [1, 1]} : vector<2x128xf32> to vector<2x32xf32>
    %121 = arith.negf %120 : vector<2x32xf32>
    %122 = math.exp %121 : vector<2x32xf32>
    %cst_110 = arith.constant 1.000000e+00 : f32
    %123 = vector.broadcast %cst_110 : f32 to vector<2x32xf32>
    %124 = arith.addf %123, %122 : vector<2x32xf32>
    %125 = arith.divf %123, %124 : vector<2x32xf32>
    %126 = vector.extract_strided_slice %119 {offsets = [0, 32], sizes = [2, 32], strides = [1, 1]} : vector<2x128xf32> to vector<2x32xf32>
    %127 = arith.negf %126 : vector<2x32xf32>
    %128 = math.exp %127 : vector<2x32xf32>
    %cst_111 = arith.constant 1.000000e+00 : f32
    %129 = vector.broadcast %cst_111 : f32 to vector<2x32xf32>
    %130 = arith.addf %129, %128 : vector<2x32xf32>
    %131 = arith.divf %129, %130 : vector<2x32xf32>
    %132 = vector.extract_strided_slice %119 {offsets = [0, 64], sizes = [2, 32], strides = [1, 1]} : vector<2x128xf32> to vector<2x32xf32>
    %133 = math.tanh %132 : vector<2x32xf32>
    %134 = vector.extract_strided_slice %119 {offsets = [0, 96], sizes = [2, 32], strides = [1, 1]} : vector<2x128xf32> to vector<2x32xf32>
    %135 = arith.negf %134 : vector<2x32xf32>
    %136 = math.exp %135 : vector<2x32xf32>
    %cst_112 = arith.constant 1.000000e+00 : f32
    %137 = vector.broadcast %cst_112 : f32 to vector<2x32xf32>
    %138 = arith.addf %137, %136 : vector<2x32xf32>
    %139 = arith.divf %137, %138 : vector<2x32xf32>
    %140 = arith.mulf %131, %114 : vector<2x32xf32>
    %141 = arith.mulf %125, %133 : vector<2x32xf32>
    %142 = arith.addf %140, %141 : vector<2x32xf32>
    %143 = math.tanh %142 : vector<2x32xf32>
    %144 = arith.mulf %139, %143 : vector<2x32xf32>
    %145 = vector.extract_strided_slice %85 {offsets = [4, 0], sizes = [2, 128], strides = [1, 1]} : vector<16x128xf32> to vector<2x128xf32>
    %cst_113 = arith.constant dense<0.000000e+00> : vector<2x128xf32>
    %146 = tpu.matmul %144, %86, %cst_113 {dimension_numbers = #tpu.dot_dimension_numbers<[1], [0], [0], [1], [0, 0, 1, 1], [], []>} : vector<2x32xf32>, vector<32x128xf32>, vector<2x128xf32> -> vector<2x128xf32>
    %147 = arith.addf %145, %146 : vector<2x128xf32>
    %148 = vector.extract_strided_slice %147 {offsets = [0, 0], sizes = [2, 32], strides = [1, 1]} : vector<2x128xf32> to vector<2x32xf32>
    %149 = arith.negf %148 : vector<2x32xf32>
    %150 = math.exp %149 : vector<2x32xf32>
    %cst_114 = arith.constant 1.000000e+00 : f32
    %151 = vector.broadcast %cst_114 : f32 to vector<2x32xf32>
    %152 = arith.addf %151, %150 : vector<2x32xf32>
    %153 = arith.divf %151, %152 : vector<2x32xf32>
    %154 = vector.extract_strided_slice %147 {offsets = [0, 32], sizes = [2, 32], strides = [1, 1]} : vector<2x128xf32> to vector<2x32xf32>
    %155 = arith.negf %154 : vector<2x32xf32>
    %156 = math.exp %155 : vector<2x32xf32>
    %cst_115 = arith.constant 1.000000e+00 : f32
    %157 = vector.broadcast %cst_115 : f32 to vector<2x32xf32>
    %158 = arith.addf %157, %156 : vector<2x32xf32>
    %159 = arith.divf %157, %158 : vector<2x32xf32>
    %160 = vector.extract_strided_slice %147 {offsets = [0, 64], sizes = [2, 32], strides = [1, 1]} : vector<2x128xf32> to vector<2x32xf32>
    %161 = math.tanh %160 : vector<2x32xf32>
    %162 = vector.extract_strided_slice %147 {offsets = [0, 96], sizes = [2, 32], strides = [1, 1]} : vector<2x128xf32> to vector<2x32xf32>
    %163 = arith.negf %162 : vector<2x32xf32>
    %164 = math.exp %163 : vector<2x32xf32>
    %cst_116 = arith.constant 1.000000e+00 : f32
    %165 = vector.broadcast %cst_116 : f32 to vector<2x32xf32>
    %166 = arith.addf %165, %164 : vector<2x32xf32>
    %167 = arith.divf %165, %166 : vector<2x32xf32>
    %168 = arith.mulf %159, %142 : vector<2x32xf32>
    %169 = arith.mulf %153, %161 : vector<2x32xf32>
    %170 = arith.addf %168, %169 : vector<2x32xf32>
    %171 = math.tanh %170 : vector<2x32xf32>
    %172 = arith.mulf %167, %171 : vector<2x32xf32>
    %173 = vector.extract_strided_slice %85 {offsets = [6, 0], sizes = [2, 128], strides = [1, 1]} : vector<16x128xf32> to vector<2x128xf32>
    %cst_117 = arith.constant dense<0.000000e+00> : vector<2x128xf32>
    %174 = tpu.matmul %172, %86, %cst_117 {dimension_numbers = #tpu.dot_dimension_numbers<[1], [0], [0], [1], [0, 0, 1, 1], [], []>} : vector<2x32xf32>, vector<32x128xf32>, vector<2x128xf32> -> vector<2x128xf32>
    %175 = arith.addf %173, %174 : vector<2x128xf32>
    %176 = vector.extract_strided_slice %175 {offsets = [0, 0], sizes = [2, 32], strides = [1, 1]} : vector<2x128xf32> to vector<2x32xf32>
    %177 = arith.negf %176 : vector<2x32xf32>
    %178 = math.exp %177 : vector<2x32xf32>
    %cst_118 = arith.constant 1.000000e+00 : f32
    %179 = vector.broadcast %cst_118 : f32 to vector<2x32xf32>
    %180 = arith.addf %179, %178 : vector<2x32xf32>
    %181 = arith.divf %179, %180 : vector<2x32xf32>
    %182 = vector.extract_strided_slice %175 {offsets = [0, 32], sizes = [2, 32], strides = [1, 1]} : vector<2x128xf32> to vector<2x32xf32>
    %183 = arith.negf %182 : vector<2x32xf32>
    %184 = math.exp %183 : vector<2x32xf32>
    %cst_119 = arith.constant 1.000000e+00 : f32
    %185 = vector.broadcast %cst_119 : f32 to vector<2x32xf32>
    %186 = arith.addf %185, %184 : vector<2x32xf32>
    %187 = arith.divf %185, %186 : vector<2x32xf32>
    %188 = vector.extract_strided_slice %175 {offsets = [0, 64], sizes = [2, 32], strides = [1, 1]} : vector<2x128xf32> to vector<2x32xf32>
    %189 = math.tanh %188 : vector<2x32xf32>
    %190 = vector.extract_strided_slice %175 {offsets = [0, 96], sizes = [2, 32], strides = [1, 1]} : vector<2x128xf32> to vector<2x32xf32>
    %191 = arith.negf %190 : vector<2x32xf32>
    %192 = math.exp %191 : vector<2x32xf32>
    %cst_120 = arith.constant 1.000000e+00 : f32
    %193 = vector.broadcast %cst_120 : f32 to vector<2x32xf32>
    %194 = arith.addf %193, %192 : vector<2x32xf32>
    %195 = arith.divf %193, %194 : vector<2x32xf32>
    %196 = arith.mulf %187, %170 : vector<2x32xf32>
    %197 = arith.mulf %181, %189 : vector<2x32xf32>
    %198 = arith.addf %196, %197 : vector<2x32xf32>
    %199 = math.tanh %198 : vector<2x32xf32>
    %200 = arith.mulf %195, %199 : vector<2x32xf32>
    %201 = vector.extract_strided_slice %85 {offsets = [8, 0], sizes = [2, 128], strides = [1, 1]} : vector<16x128xf32> to vector<2x128xf32>
    %cst_121 = arith.constant dense<0.000000e+00> : vector<2x128xf32>
    %202 = tpu.matmul %200, %86, %cst_121 {dimension_numbers = #tpu.dot_dimension_numbers<[1], [0], [0], [1], [0, 0, 1, 1], [], []>} : vector<2x32xf32>, vector<32x128xf32>, vector<2x128xf32> -> vector<2x128xf32>
    %203 = arith.addf %201, %202 : vector<2x128xf32>
    %204 = vector.extract_strided_slice %203 {offsets = [0, 0], sizes = [2, 32], strides = [1, 1]} : vector<2x128xf32> to vector<2x32xf32>
    %205 = arith.negf %204 : vector<2x32xf32>
    %206 = math.exp %205 : vector<2x32xf32>
    %cst_122 = arith.constant 1.000000e+00 : f32
    %207 = vector.broadcast %cst_122 : f32 to vector<2x32xf32>
    %208 = arith.addf %207, %206 : vector<2x32xf32>
    %209 = arith.divf %207, %208 : vector<2x32xf32>
    %210 = vector.extract_strided_slice %203 {offsets = [0, 32], sizes = [2, 32], strides = [1, 1]} : vector<2x128xf32> to vector<2x32xf32>
    %211 = arith.negf %210 : vector<2x32xf32>
    %212 = math.exp %211 : vector<2x32xf32>
    %cst_123 = arith.constant 1.000000e+00 : f32
    %213 = vector.broadcast %cst_123 : f32 to vector<2x32xf32>
    %214 = arith.addf %213, %212 : vector<2x32xf32>
    %215 = arith.divf %213, %214 : vector<2x32xf32>
    %216 = vector.extract_strided_slice %203 {offsets = [0, 64], sizes = [2, 32], strides = [1, 1]} : vector<2x128xf32> to vector<2x32xf32>
    %217 = math.tanh %216 : vector<2x32xf32>
    %218 = vector.extract_strided_slice %203 {offsets = [0, 96], sizes = [2, 32], strides = [1, 1]} : vector<2x128xf32> to vector<2x32xf32>
    %219 = arith.negf %218 : vector<2x32xf32>
    %220 = math.exp %219 : vector<2x32xf32>
    %cst_124 = arith.constant 1.000000e+00 : f32
    %221 = vector.broadcast %cst_124 : f32 to vector<2x32xf32>
    %222 = arith.addf %221, %220 : vector<2x32xf32>
    %223 = arith.divf %221, %222 : vector<2x32xf32>
    %224 = arith.mulf %215, %198 : vector<2x32xf32>
    %225 = arith.mulf %209, %217 : vector<2x32xf32>
    %226 = arith.addf %224, %225 : vector<2x32xf32>
    %227 = math.tanh %226 : vector<2x32xf32>
    %228 = arith.mulf %223, %227 : vector<2x32xf32>
    %229 = vector.extract_strided_slice %85 {offsets = [10, 0], sizes = [2, 128], strides = [1, 1]} : vector<16x128xf32> to vector<2x128xf32>
    %cst_125 = arith.constant dense<0.000000e+00> : vector<2x128xf32>
    %230 = tpu.matmul %228, %86, %cst_125 {dimension_numbers = #tpu.dot_dimension_numbers<[1], [0], [0], [1], [0, 0, 1, 1], [], []>} : vector<2x32xf32>, vector<32x128xf32>, vector<2x128xf32> -> vector<2x128xf32>
    %231 = arith.addf %229, %230 : vector<2x128xf32>
    %232 = vector.extract_strided_slice %231 {offsets = [0, 0], sizes = [2, 32], strides = [1, 1]} : vector<2x128xf32> to vector<2x32xf32>
    %233 = arith.negf %232 : vector<2x32xf32>
    %234 = math.exp %233 : vector<2x32xf32>
    %cst_126 = arith.constant 1.000000e+00 : f32
    %235 = vector.broadcast %cst_126 : f32 to vector<2x32xf32>
    %236 = arith.addf %235, %234 : vector<2x32xf32>
    %237 = arith.divf %235, %236 : vector<2x32xf32>
    %238 = vector.extract_strided_slice %231 {offsets = [0, 32], sizes = [2, 32], strides = [1, 1]} : vector<2x128xf32> to vector<2x32xf32>
    %239 = arith.negf %238 : vector<2x32xf32>
    %240 = math.exp %239 : vector<2x32xf32>
    %cst_127 = arith.constant 1.000000e+00 : f32
    %241 = vector.broadcast %cst_127 : f32 to vector<2x32xf32>
    %242 = arith.addf %241, %240 : vector<2x32xf32>
    %243 = arith.divf %241, %242 : vector<2x32xf32>
    %244 = vector.extract_strided_slice %231 {offsets = [0, 64], sizes = [2, 32], strides = [1, 1]} : vector<2x128xf32> to vector<2x32xf32>
    %245 = math.tanh %244 : vector<2x32xf32>
    %246 = vector.extract_strided_slice %231 {offsets = [0, 96], sizes = [2, 32], strides = [1, 1]} : vector<2x128xf32> to vector<2x32xf32>
    %247 = arith.negf %246 : vector<2x32xf32>
    %248 = math.exp %247 : vector<2x32xf32>
    %cst_128 = arith.constant 1.000000e+00 : f32
    %249 = vector.broadcast %cst_128 : f32 to vector<2x32xf32>
    %250 = arith.addf %249, %248 : vector<2x32xf32>
    %251 = arith.divf %249, %250 : vector<2x32xf32>
    %252 = arith.mulf %243, %226 : vector<2x32xf32>
    %253 = arith.mulf %237, %245 : vector<2x32xf32>
    %254 = arith.addf %252, %253 : vector<2x32xf32>
    %255 = math.tanh %254 : vector<2x32xf32>
    %256 = arith.mulf %251, %255 : vector<2x32xf32>
    %257 = vector.extract_strided_slice %85 {offsets = [12, 0], sizes = [2, 128], strides = [1, 1]} : vector<16x128xf32> to vector<2x128xf32>
    %cst_129 = arith.constant dense<0.000000e+00> : vector<2x128xf32>
    %258 = tpu.matmul %256, %86, %cst_129 {dimension_numbers = #tpu.dot_dimension_numbers<[1], [0], [0], [1], [0, 0, 1, 1], [], []>} : vector<2x32xf32>, vector<32x128xf32>, vector<2x128xf32> -> vector<2x128xf32>
    %259 = arith.addf %257, %258 : vector<2x128xf32>
    %260 = vector.extract_strided_slice %259 {offsets = [0, 0], sizes = [2, 32], strides = [1, 1]} : vector<2x128xf32> to vector<2x32xf32>
    %261 = arith.negf %260 : vector<2x32xf32>
    %262 = math.exp %261 : vector<2x32xf32>
    %cst_130 = arith.constant 1.000000e+00 : f32
    %263 = vector.broadcast %cst_130 : f32 to vector<2x32xf32>
    %264 = arith.addf %263, %262 : vector<2x32xf32>
    %265 = arith.divf %263, %264 : vector<2x32xf32>
    %266 = vector.extract_strided_slice %259 {offsets = [0, 32], sizes = [2, 32], strides = [1, 1]} : vector<2x128xf32> to vector<2x32xf32>
    %267 = arith.negf %266 : vector<2x32xf32>
    %268 = math.exp %267 : vector<2x32xf32>
    %cst_131 = arith.constant 1.000000e+00 : f32
    %269 = vector.broadcast %cst_131 : f32 to vector<2x32xf32>
    %270 = arith.addf %269, %268 : vector<2x32xf32>
    %271 = arith.divf %269, %270 : vector<2x32xf32>
    %272 = vector.extract_strided_slice %259 {offsets = [0, 64], sizes = [2, 32], strides = [1, 1]} : vector<2x128xf32> to vector<2x32xf32>
    %273 = math.tanh %272 : vector<2x32xf32>
    %274 = vector.extract_strided_slice %259 {offsets = [0, 96], sizes = [2, 32], strides = [1, 1]} : vector<2x128xf32> to vector<2x32xf32>
    %275 = arith.negf %274 : vector<2x32xf32>
    %276 = math.exp %275 : vector<2x32xf32>
    %cst_132 = arith.constant 1.000000e+00 : f32
    %277 = vector.broadcast %cst_132 : f32 to vector<2x32xf32>
    %278 = arith.addf %277, %276 : vector<2x32xf32>
    %279 = arith.divf %277, %278 : vector<2x32xf32>
    %280 = arith.mulf %271, %254 : vector<2x32xf32>
    %281 = arith.mulf %265, %273 : vector<2x32xf32>
    %282 = arith.addf %280, %281 : vector<2x32xf32>
    %283 = math.tanh %282 : vector<2x32xf32>
    %284 = arith.mulf %279, %283 : vector<2x32xf32>
    %285 = vector.extract_strided_slice %85 {offsets = [14, 0], sizes = [2, 128], strides = [1, 1]} : vector<16x128xf32> to vector<2x128xf32>
    %cst_133 = arith.constant dense<0.000000e+00> : vector<2x128xf32>
    %286 = tpu.matmul %284, %86, %cst_133 {dimension_numbers = #tpu.dot_dimension_numbers<[1], [0], [0], [1], [0, 0, 1, 1], [], []>} : vector<2x32xf32>, vector<32x128xf32>, vector<2x128xf32> -> vector<2x128xf32>
    %287 = arith.addf %285, %286 : vector<2x128xf32>
    %288 = vector.extract_strided_slice %287 {offsets = [0, 0], sizes = [2, 32], strides = [1, 1]} : vector<2x128xf32> to vector<2x32xf32>
    %289 = arith.negf %288 : vector<2x32xf32>
    %290 = math.exp %289 : vector<2x32xf32>
    %cst_134 = arith.constant 1.000000e+00 : f32
    %291 = vector.broadcast %cst_134 : f32 to vector<2x32xf32>
    %292 = arith.addf %291, %290 : vector<2x32xf32>
    %293 = arith.divf %291, %292 : vector<2x32xf32>
    %294 = vector.extract_strided_slice %287 {offsets = [0, 32], sizes = [2, 32], strides = [1, 1]} : vector<2x128xf32> to vector<2x32xf32>
    %295 = arith.negf %294 : vector<2x32xf32>
    %296 = math.exp %295 : vector<2x32xf32>
    %cst_135 = arith.constant 1.000000e+00 : f32
    %297 = vector.broadcast %cst_135 : f32 to vector<2x32xf32>
    %298 = arith.addf %297, %296 : vector<2x32xf32>
    %299 = arith.divf %297, %298 : vector<2x32xf32>
    %300 = vector.extract_strided_slice %287 {offsets = [0, 64], sizes = [2, 32], strides = [1, 1]} : vector<2x128xf32> to vector<2x32xf32>
    %301 = math.tanh %300 : vector<2x32xf32>
    %302 = vector.extract_strided_slice %287 {offsets = [0, 96], sizes = [2, 32], strides = [1, 1]} : vector<2x128xf32> to vector<2x32xf32>
    %303 = arith.negf %302 : vector<2x32xf32>
    %304 = math.exp %303 : vector<2x32xf32>
    %cst_136 = arith.constant 1.000000e+00 : f32
    %305 = vector.broadcast %cst_136 : f32 to vector<2x32xf32>
    %306 = arith.addf %305, %304 : vector<2x32xf32>
    %307 = arith.divf %305, %306 : vector<2x32xf32>
    %308 = arith.mulf %299, %282 : vector<2x32xf32>
    %309 = arith.mulf %293, %301 : vector<2x32xf32>
    %310 = arith.addf %308, %309 : vector<2x32xf32>
    %311 = math.tanh %310 : vector<2x32xf32>
    %312 = arith.mulf %307, %311 : vector<2x32xf32>
    %313 = vector.extract_strided_slice %116 {offsets = [0, 0], sizes = [2, 16], strides = [1, 1]} : vector<2x32xf32> to vector<2x16xf32>
    %314 = vector.extract_strided_slice %312 {offsets = [0, 16], sizes = [2, 16], strides = [1, 1]} : vector<2x32xf32> to vector<2x16xf32>
    %315 = tpu.concatenate %313, %314 in 1 : vector<2x16xf32>, vector<2x16xf32> -> vector<2x32xf32>
    %316 = vector.extract_strided_slice %144 {offsets = [0, 0], sizes = [2, 16], strides = [1, 1]} : vector<2x32xf32> to vector<2x16xf32>
    %317 = vector.extract_strided_slice %284 {offsets = [0, 16], sizes = [2, 16], strides = [1, 1]} : vector<2x32xf32> to vector<2x16xf32>
    %318 = tpu.concatenate %316, %317 in 1 : vector<2x16xf32>, vector<2x16xf32> -> vector<2x32xf32>
    %319 = vector.extract_strided_slice %172 {offsets = [0, 0], sizes = [2, 16], strides = [1, 1]} : vector<2x32xf32> to vector<2x16xf32>
    %320 = vector.extract_strided_slice %256 {offsets = [0, 16], sizes = [2, 16], strides = [1, 1]} : vector<2x32xf32> to vector<2x16xf32>
    %321 = tpu.concatenate %319, %320 in 1 : vector<2x16xf32>, vector<2x16xf32> -> vector<2x32xf32>
    %322 = vector.extract_strided_slice %200 {offsets = [0, 0], sizes = [2, 16], strides = [1, 1]} : vector<2x32xf32> to vector<2x16xf32>
    %323 = vector.extract_strided_slice %228 {offsets = [0, 16], sizes = [2, 16], strides = [1, 1]} : vector<2x32xf32> to vector<2x16xf32>
    %324 = tpu.concatenate %322, %323 in 1 : vector<2x16xf32>, vector<2x16xf32> -> vector<2x32xf32>
    %325 = vector.extract_strided_slice %228 {offsets = [0, 0], sizes = [2, 16], strides = [1, 1]} : vector<2x32xf32> to vector<2x16xf32>
    %326 = vector.extract_strided_slice %200 {offsets = [0, 16], sizes = [2, 16], strides = [1, 1]} : vector<2x32xf32> to vector<2x16xf32>
    %327 = tpu.concatenate %325, %326 in 1 : vector<2x16xf32>, vector<2x16xf32> -> vector<2x32xf32>
    %328 = vector.extract_strided_slice %256 {offsets = [0, 0], sizes = [2, 16], strides = [1, 1]} : vector<2x32xf32> to vector<2x16xf32>
    %329 = vector.extract_strided_slice %172 {offsets = [0, 16], sizes = [2, 16], strides = [1, 1]} : vector<2x32xf32> to vector<2x16xf32>
    %330 = tpu.concatenate %328, %329 in 1 : vector<2x16xf32>, vector<2x16xf32> -> vector<2x32xf32>
    %331 = vector.extract_strided_slice %284 {offsets = [0, 0], sizes = [2, 16], strides = [1, 1]} : vector<2x32xf32> to vector<2x16xf32>
    %332 = vector.extract_strided_slice %144 {offsets = [0, 16], sizes = [2, 16], strides = [1, 1]} : vector<2x32xf32> to vector<2x16xf32>
    %333 = tpu.concatenate %331, %332 in 1 : vector<2x16xf32>, vector<2x16xf32> -> vector<2x32xf32>
    %334 = vector.extract_strided_slice %312 {offsets = [0, 0], sizes = [2, 16], strides = [1, 1]} : vector<2x32xf32> to vector<2x16xf32>
    %335 = vector.extract_strided_slice %116 {offsets = [0, 16], sizes = [2, 16], strides = [1, 1]} : vector<2x32xf32> to vector<2x16xf32>
    %336 = tpu.concatenate %334, %335 in 1 : vector<2x16xf32>, vector<2x16xf32> -> vector<2x32xf32>
    %337 = tpu.concatenate %315, %318, %321, %324, %327, %330, %333, %336 in 1 : vector<2x32xf32>, vector<2x32xf32>, vector<2x32xf32>, vector<2x32xf32>, vector<2x32xf32>, vector<2x32xf32>, vector<2x32xf32>, vector<2x32xf32> -> vector<2x256xf32>
    %c0_137 = arith.constant 0 : index
    %c0_138 = arith.constant 0 : index
    %338 = vector.load %arg6[%c0_137, %c0_138] : memref<2x256xf32, #tpu.memory_space<vmem>>, vector<2x256xf32>
    tpu.vector_store %arg6[%c0_137, %c0_138], %337 {strides = array<i32>} : memref<2x256xf32, #tpu.memory_space<vmem>>, vector<2x256xf32>,
    %339 = vector.extract_strided_slice %312 {offsets = [0, 0], sizes = [2, 16], strides = [1, 1]} : vector<2x32xf32> to vector<2x16xf32>
    %340 = vector.extract_strided_slice %312 {offsets = [0, 16], sizes = [2, 16], strides = [1, 1]} : vector<2x32xf32> to vector<2x16xf32>
    %341 = tpu.concatenate %339, %340 in 0 : vector<2x16xf32>, vector<2x16xf32> -> vector<4x16xf32>
    %c0_139 = arith.constant 0 : index
    %c0_140 = arith.constant 0 : index
    %342 = vector.load %arg7[%c0_139, %c0_140] : memref<4x16xf32, #tpu.memory_space<vmem>>, vector<4x16xf32>
    tpu.vector_store %arg7[%c0_139, %c0_140], %341 {strides = array<i32>} : memref<4x16xf32, #tpu.memory_space<vmem>>, vector<4x16xf32>,
    %343 = vector.extract_strided_slice %310 {offsets = [0, 0], sizes = [2, 16], strides = [1, 1]} : vector<2x32xf32> to vector<2x16xf32>
    %344 = vector.extract_strided_slice %310 {offsets = [0, 16], sizes = [2, 16], strides = [1, 1]} : vector<2x32xf32> to vector<2x16xf32>
    %345 = tpu.concatenate %343, %344 in 0 : vector<2x16xf32>, vector<2x16xf32> -> vector<4x16xf32>
    %c0_141 = arith.constant 0 : index
    %c0_142 = arith.constant 0 : index
    %346 = vector.load %arg8[%c0_141, %c0_142] : memref<4x16xf32, #tpu.memory_space<vmem>>, vector<4x16xf32>
    tpu.vector_store %arg8[%c0_141, %c0_142], %345 {strides = array<i32>} : memref<4x16xf32, #tpu.memory_space<vmem>>, vector<4x16xf32>,
    return
  }
  func.func @transform_0(%arg0: i32, %arg1: memref<2x8xi32, #tpu.memory_space<smem>>) -> (i32, i32) {
    %c0_i32 = arith.constant 0 : i32
    %c0_i32_0 = arith.constant 0 : i32
    %c0_i32_1 = arith.constant 0 : i32
    return %c0_i32, %c0_i32_0 : i32, i32
  }
  func.func @transform_1(%arg0: i32, %arg1: memref<2x8xi32, #tpu.memory_space<smem>>) -> (i32, i32) {
    %c0_i32 = arith.constant 0 : i32
    %c0_i32_0 = arith.constant 0 : i32
    %c0_i32_1 = arith.constant 0 : i32
    return %c0_i32, %c0_i32_0 : i32, i32
  }
  func.func @transform_2(%arg0: i32, %arg1: memref<2x8xi32, #tpu.memory_space<smem>>) -> (i32, i32) {
    %c0_i32 = arith.constant 0 : i32
    %c0_i32_0 = arith.constant 0 : i32
    %c0_i32_1 = arith.constant 0 : i32
    return %c0_i32, %c0_i32_0 : i32, i32
  }
  func.func @transform_3(%arg0: i32, %arg1: memref<2x8xi32, #tpu.memory_space<smem>>) -> (i32, i32) {
    %c0_i32 = arith.constant 0 : i32
    %c0_i32_0 = arith.constant 0 : i32
    %c0_i32_1 = arith.constant 0 : i32
    return %c0_i32, %c0_i32_0 : i32, i32
  }
  func.func @transform_4(%arg0: i32, %arg1: memref<2x8xi32, #tpu.memory_space<smem>>) -> (i32, i32) {
    %c0_i32 = arith.constant 0 : i32
    %c0_i32_0 = arith.constant 0 : i32
    %c0_i32_1 = arith.constant 0 : i32
    return %c0_i32, %c0_i32_0 : i32, i32
  }
  func.func @transform_5(%arg0: i32, %arg1: memref<2x8xi32, #tpu.memory_space<smem>>) -> (i32, i32) {
    %c0_i32 = arith.constant 0 : i32
    %c0_i32_0 = arith.constant 0 : i32
    %c0_i32_1 = arith.constant 0 : i32
    return %c0_i32, %c0_i32_0 : i32, i32
  }
  func.func @transform_6(%arg0: i32, %arg1: memref<2x8xi32, #tpu.memory_space<smem>>) -> (i32, i32) {
    %c0_i32 = arith.constant 0 : i32
    %c0_i32_0 = arith.constant 0 : i32
    %c0_i32_1 = arith.constant 0 : i32
    return %c0_i32, %c0_i32_0 : i32, i32
  }
}

</mosaic_0001>

<bundles_post_ra>
// kernel: encoder_rnn_forward.1
= control target key start
LH: loop header
LB: loop body
LE: loop exit
PB: predicated region body
PF: predicated region fallthrough
CT: control target
= control target key end

     0   :  { %s2123_s0 = inlined_call_operand.vmem [shape: s32[2,8], index: 0, kind: input, shape index: {}]   ;;  %s2124_s1 = inlined_call_operand.vmem [shape: f32[64,32], index: 1, kind: input, shape index: {}]   ;;  %s2125_s2 = inlined_call_operand.vmem [shape: f32[64,128], index: 2, kind: input, shape index: {}]   ;;  %s2126_s3 = inlined_call_operand.vmem [shape: f32[32,128], index: 3, kind: input, shape index: {}]   ;;  %s2127_s4 = inlined_call_operand.vmem [shape: f32[1,128], index: 4, kind: input, shape index: {}]   ;;  %s2128_s5 = inlined_call_operand.vmem [shape: f32[2,256], index: 5, kind: output, shape index: {0}]   ;;  %s2129_s6 = inlined_call_operand.hbm [shape: f32[4,16], index: 6, kind: output, shape index: {1}]   ;;  %s2130_s7 = inlined_call_operand.hbm [shape: f32[4,16], index: 7, kind: output, shape index: {2}]  }
   0x1   :  { %s13_s26 = sshll.u32 %s2123_s0, 4  ;;  %s14_s26 = int_to_ptr.vmem [resolvable:$true] %s13_s26 }
   0x2   :  { %s1632_s27 = scalar_lea.vmem %s14_s26, 32  ;;  %p1637_p1 = scmp.lt.s32.totalorder %s14_s26, %s14_s26 }
   0x3   :  { %p1633_p0 = scmp.ne.s32.totalorder %s14_s26, %s1632_s27  ;;  %p1638_p2 = scmp.lt.s32.totalorder %s1632_s27, %s1632_s27 }
   0x5   :  { %p1639_p3 = por %p1638_p2, %p1637_p1 }
   0x7   :  { %p1640_p4 = pnand %p1639_p3, %p1633_p0 }
   0x9   :  { %1643 = shalt.err (!%p1640_p4)  }
   0xa   :  { %s1694_s28 = smov [#allocation4]  }
   0xb   :  { %16 = dma.vmem_to_smem %s14_s26, 32, %s1694_s28, [#allocation3] }
   0xc   :  { %1688 = dma.done.wait [#allocation3], 32 }
   0xd   :  { %1689 = vsyncadd [#allocation3], 4294967264 }
   0xe   :  { %18 = sfence }
   0xf   :  { %19 = vsyncpa [#allocation6], 0  ;;  %s1304_s29 = sld [smem:[#allocation4 + $0x1]]  ;;  %s29_s30 = sld [smem:[#allocation4]] }
  0x10   :  { %s1305_s8 = sld [smem:[#allocation4 + $0x81]] }
  0x11   :  { %20 = vsyncpa [#allocation8], 0  ;;  %s1303_s9 = sld [smem:[#allocation4 + $0x80]]  ;;  %s1307_s0 = sld [smem:[#allocation4 + $0x82]]  ;;  %vm32_vm0 = vcmask 253952   ;;  %v177_v8 = vld [vmem:[%s2125_s2] sm:$0xff] }
  0x12   :  { %s1306_s10 = sld [smem:[#allocation4 + $0x2]]  ;;  %s1309_s11 = sld [smem:[#allocation4 + $0x83]]  ;;  %v178_v9 = vld [vmem:[%s2125_s2 + $0x8] sm:$0xff]  ;;  %v179_v11 = vld [vmem:[%s2125_s2 + $0x10] sm:$0xff]  ;;  %v180_v12 = vld [vmem:[%s2125_s2 + $0x18] sm:$0xff]  ;;  %v1696_v26 = vmov 0.0|0.0  }
  0x13   :  { %s1308_s12 = sld [smem:[#allocation4 + $0x3]]  ;;  %s1695_s22 = smov 32   ;;  %v1494_v10 = vpack.c.bf16 %v178_v9, %v177_v8  ;;  %v1498_v13 = vpack.c.bf16 %v180_v12, %v179_v11  ;;  %v181_v16 = vld [vmem:[%s2125_s2 + $0x20] sm:$0xff]  ;;  %v182_v17 = vld [vmem:[%s2125_s2 + $0x28] sm:$0xff]  ;;  %v183_v21 = vld [vmem:[%s2125_s2 + $0x30] sm:$0xff]  ;;  %1510 = vmatprep.subr.bf16.mxu1 %v1696_v26  ;;  %vm1697_vm1 = vmmov 0  }
  0x14   :  { %s1311_s17 = sld [smem:[#allocation4 + $0x84]]  ;;  %s1798_s26 = sld [smem:[#allocation4 + $0x86]]  ;;  %v1502_v18 = vpack.c.bf16 %v182_v17, %v181_v16  ;;  %v274_v19 = vld [vmem:[%s2126_s3] sm:$0xff]  ;;  %v275_v20 = vld [vmem:[%s2126_s3 + $0x8] sm:$0xff]  ;;  %v184_v24 = vld [vmem:[%s2125_s2 + $0x38] sm:$0xff]  ;;  %v1698_v35 = vmov 0.0  }
  0x15   :  { %s50_s15 = scalar_lea.vmem %s2124_s1, %s1304_s29  ;;  %s30_s18 = scalar_lea.vmem %s2124_s1, %s29_s30  ;;  %1495 = vmatprep.subr.bf16.mxu0 %v1494_v10  ;;  %v1848_v23 = vpack.c.bf16 %v275_v20, %v274_v19  ;;  %v1506_v27 = vpack.c.bf16 %v184_v24, %v183_v21  ;;  %v276_v29 = vld [vmem:[%s2126_s3 + $0x10] sm:$0xff]  ;;  %v277_v30 = vld [vmem:[%s2126_s3 + $0x18] sm:$0xff]  ;;  %1414 = vmatprep.mubr.msk.f32.mxu1 %vm1697_vm1, %v1698_v35  ;;  %vm38_vm2 = vcmask 516352   ;;  %vm192_vm3 = vcmask 523264   ;;  %v1318_v56 = vld [vmem:[%s2127_s4] ss:$0 sm:$0xff] }
  0x16   :  { %v51_v0 = vld [vmem:[%s50_s15] sm:$0x1]  ;;  %s59_s21 = scalar_lea.vmem %s2124_s1, %s1305_s8  ;;  %1497 = vmatpush3.bf16.msra.mxu0 %v1494_v10  ;;  %v1876_v32 = vpack.c.bf16 %v277_v30, %v276_v29  ;;  %vm278_vm4 = vcmask 261120   ;;  %s1700_s4 = smov 112   ;;  %vm1127_vm5 = vcmask 130048   ;;  %vm1234_vm6 = vcmask 1041408  }
  0x17   :  { %54 = vrot.lane.b32.xlu1 %v51_v0, %s1695_s22  ;;  %52 = vst.msk [vmem:[#allocation2 + $0x2] sm:$0x1] %vm32_vm0, %v51_v0  ;;  %v31_v1 = vld [vmem:[%s30_s18] sm:$0x1]  ;;  %s41_s25 = scalar_lea.vmem %s2124_s1, %s1303_s9  ;;  %s77_s28 = scalar_lea.vmem %s2124_s1, %s1307_s0  ;;  %1499 = vmatprep.subr.bf16.mxu0 %v1498_v13  ;;  %vm1212_vm7 = vcmask 785408   ;;  %vm1240_vm8 = vcmask 125952  }
  0x18   :  { %v60_v2 = vld [vmem:[%s59_s21] sm:$0x1]  ;;  %35 = vrot.lane.b32.xlu0 %v31_v1, %s1695_s22  ;;  %33 = vst.msk [vmem:[#allocation2] sm:$0x1] %vm32_vm0, %v31_v1  ;;  %s68_s8 = scalar_lea.vmem %s2124_s1, %s1306_s10  ;;  %s95_s9 = scalar_lea.vmem %s2124_s1, %s1309_s11  ;;  %1512 = vmatpush3.bf16.msra.mxu1 %v1848_v23 }
  0x19   :  { %61 = vst.msk [vmem:[#allocation2 + $0x3] sm:$0x1] %vm32_vm0, %v60_v2  ;;  %v42_v3 = vld [vmem:[%s41_s25] sm:$0x1]  ;;  %s86_s16 = scalar_lea.vmem %s2124_s1, %s1308_s12  ;;  %s1310_s10 = sld [smem:[#allocation4 + $0x4]]  ;;  %1513 = vmatprep.subr.bf16.mxu1 %v1696_v26 }
  0x1a   :  { %v78_v4 = vld [vmem:[%s77_s28] sm:$0x1]  ;;  %43 = vst.msk [vmem:[#allocation2 + $0x1] sm:$0x1] %vm32_vm0, %v42_v3  ;;  %s1783_s11 = sld [smem:[#allocation4 + $0x85]]  ;;  %s113_s25 = scalar_lea.vmem %s2124_s1, %s1311_s17  ;;  %1501 = vmatpush3.bf16.msra.mxu0 %v1498_v13 }
  0x1b   :  { %79 = vst.msk [vmem:[#allocation2 + $0x5] sm:$0x1] %vm32_vm0, %v78_v4  ;;  %v69_v5 = vld [vmem:[%s68_s8] sm:$0x1]  ;;  %63 = vrot.lane.b32.xlu1 %v60_v2, %s1695_s22  ;;  %s1791_s21 = sld [smem:[#allocation4 + $0x5]]  ;;  %s1821_s17 = sld [smem:[#allocation4 + $0x87]]  ;;  %1503 = vmatprep.subr.bf16.mxu0 %v1502_v18 }
  0x1c   :  { %v96_v6 = vld [vmem:[%s95_s9] sm:$0x1]  ;;  %70 = vst.msk [vmem:[#allocation2 + $0x4] sm:$0x1] %vm32_vm0, %v69_v5  ;;  %45 = vrot.lane.b32.xlu0 %v42_v3, %s1695_s22  ;;  %s1809_s9 = sld [smem:[#allocation4 + $0x6]]  ;;  %s149_s15 = scalar_lea.vmem %s2124_s1, %s1798_s26  ;;  %1515 = vmatpush3.bf16.msra.mxu1 %v1876_v32 }
  0x1d   :  { %97 = vst.msk [vmem:[#allocation2 + $0x7] sm:$0x1] %vm32_vm0, %v96_v6  ;;  %v87_v7 = vld [vmem:[%s86_s16] sm:$0x1]  ;;  %1516 = vmatprep.subr.bf16.mxu1 %v1696_v26  ;;  %s1703_s29 = smov [#allocation7]  }
  0x1e   :  { %88 = vst.msk [vmem:[#allocation2 + $0x6] sm:$0x1] %vm32_vm0, %v87_v7  ;;  %v1813_v14 = vld [vmem:[%s113_s25] sm:$0x1]  ;;  %s1833_s25 = sld [smem:[#allocation4 + $0x7]]  ;;  %1505 = vmatpush3.bf16.msra.mxu0 %v1502_v18  ;;  %s1273_s30 = sshll.u32 %s1703_s29, 4  ;;  %s2088_s30 = int_to_ptr.vmem [resolvable:$true] %s1273_s30 }
  0x1f   :  { %81 = vrot.lane.b32.xlu1 %v78_v4, %s1695_s22  ;;  %s104_s14 = scalar_lea.vmem %s2124_s1, %s1310_s10  ;;  %1507 = vmatprep.subr.bf16.mxu0 %v1506_v27  ;;  %v150_v28 = vld [vmem:[%s149_s15] sm:$0x1] }
  0x20   :  { %72 = vrot.lane.b32.xlu0 %v69_v5, %s1695_s22  ;;  %v1815_v15 = vld [vmem:[%s104_s14] sm:$0x1]  ;;  %s131_s16 = scalar_lea.vmem %s2124_s1, %s1783_s11  ;;  %1415 = vmatmul.mubr.f32.vlgmr.msra.gmra.mrb[0].mxu1 %v1698_v35 }
  0x21   :  { %s122_s24 = scalar_lea.vmem %s2124_s1, %s1791_s21  ;;  %v132_v22 = vld [vmem:[%s131_s16] sm:$0x1]  ;;  %s167_s23 = scalar_lea.vmem %s2124_s1, %s1821_s17  ;;  %1518 = vmatpush3.bf16.msra.mxu1 %v1848_v23  ;;  %1425 = vmatprep.mubr.msk.f32.mxu1 %vm1697_vm1, %v1698_v35 }
  0x22   :  { %v123_v25 = vld [vmem:[%s122_s24] sm:$0x1]  ;;  %s140_s18 = scalar_lea.vmem %s2124_s1, %s1809_s9  ;;  %1509 = vmatpush3.bf16.msra.mxu0 %v1506_v27  ;;  %1519 = vmatprep.subr.bf16.mxu1 %v1696_v26  ;;  %s1699_s17 = smov 64  }
  0x23   :  { %99 = vrot.lane.b32.xlu1 %v96_v6, %s1695_s22  ;;  %v141_v31 = vld [vmem:[%s140_s18] sm:$0x1]  ;;  %1522 = vmatprep.subr.bf16.mxu0 %v1696_v26 }
  0x24   :  { %90 = vrot.lane.b32.xlu0 %v87_v7, %s1695_s22  ;;  %s158_s27 = scalar_lea.vmem %s2124_s1, %s1833_s25  ;;  %v168_v33 = vld [vmem:[%s167_s23] sm:$0x1]  ;;  %s1701_s25 = smov 96  }
  0x25   :  { %v159_v34 = vld [vmem:[%s158_s27] sm:$0x1]  ;;  %1521 = vmatpush3.bf16.msra.mxu1 %v1876_v32 }
  0x26   :  { %1528 = vmatprep.subr.bf16.mxu1 %v1696_v26 }
  0x27   :  { %117 = vrot.lane.b32.xlu1 %v1813_v14, %s1695_s22 }
  0x28   :  { %108 = vrot.lane.b32.xlu0 %v1815_v15, %s1695_s22 }
  0x2b   :  { %135 = vrot.lane.b32.xlu1 %v132_v22, %s1695_s22 }
  0x2c   :  { %126 = vrot.lane.b32.xlu0 %v123_v25, %s1695_s22 }
  0x2f   :  { %153 = vrot.lane.b32.xlu1 %v150_v28, %s1695_s22 }
  0x30   :  { %144 = vrot.lane.b32.xlu0 %v141_v31, %s1695_s22 }
  0x33   :  { %171 = vrot.lane.b32.xlu1 %v168_v33, %s1695_s22 }
  0x34   :  { %162 = vrot.lane.b32.xlu0 %v159_v34, %s1695_s22 }
  0x89   :  { %v55_v36 = vpop.permute.xlu1 %54 }
  0x8a   :  { %57 = vst.msk [vmem:[#allocation2 + $0xc] sm:$0x1] %vm38_vm2, %v55_v36  ;;  %v36_v37 = vpop.permute.xlu0 %35 }
  0x8b   :  { %142 = vst.msk [vmem:[#allocation2 + $0xc] sm:$0x1] %vm32_vm0, %v141_v31 }
  0x8c   :  { %39 = vst.msk [vmem:[#allocation2 + $0xe] sm:$0x1] %vm38_vm2, %v36_v37 }
  0x8d   :  { %160 = vst.msk [vmem:[#allocation2 + $0xe] sm:$0x1] %vm32_vm0, %v159_v34  ;;  %v64_v38 = vpop.permute.xlu1 %63 }
  0x8e   :  { %66 = vst.msk [vmem:[#allocation2 + $0xd] sm:$0x1] %vm38_vm2, %v64_v38  ;;  %v46_v39 = vpop.permute.xlu0 %45 }
  0x8f   :  { %151 = vst.msk [vmem:[#allocation2 + $0xd] sm:$0x1] %vm32_vm0, %v150_v28 }
  0x90   :  { %48 = vst.msk [vmem:[#allocation2 + $0xf] sm:$0x1] %vm38_vm2, %v46_v39 }
  0x91   :  { %169 = vst.msk [vmem:[#allocation2 + $0xf] sm:$0x1] %vm32_vm0, %v168_v33  ;;  %v82_v40 = vpop.permute.xlu1 %81 }
  0x92   :  { %84 = vst.msk [vmem:[#allocation2 + $0xb] sm:$0x1] %vm38_vm2, %v82_v40  ;;  %v73_v41 = vpop.permute.xlu0 %72 }
  0x93   :  { %133 = vst.msk [vmem:[#allocation2 + $0xb] sm:$0x1] %vm32_vm0, %v132_v22 }
  0x94   :  { %75 = vst.msk [vmem:[#allocation2 + $0xa] sm:$0x1] %vm38_vm2, %v73_v41 }
  0x95   :  { %124 = vst.msk [vmem:[#allocation2 + $0xa] sm:$0x1] %vm32_vm0, %v123_v25  ;;  %v100_v42 = vpop.permute.xlu1 %99 }
  0x96   :  { %102 = vst.msk [vmem:[#allocation2 + $0x9] sm:$0x1] %vm38_vm2, %v100_v42  ;;  %v91_v43 = vpop.permute.xlu0 %90 }
  0x97   :  { %115 = vst.msk [vmem:[#allocation2 + $0x9] sm:$0x1] %vm32_vm0, %v1813_v14 }
  0x98   :  { %93 = vst.msk [vmem:[#allocation2 + $0x8] sm:$0x1] %vm38_vm2, %v91_v43 }
  0x99   :  { %106 = vst.msk [vmem:[#allocation2 + $0x8] sm:$0x1] %vm32_vm0, %v1815_v15  ;;  %v118_v44 = vpop.permute.xlu1 %117 }
  0x9a   :  { %120 = vst.msk [vmem:[#allocation2 + $0x7] sm:$0x1] %vm38_vm2, %v118_v44  ;;  %v109_v45 = vpop.permute.xlu0 %108 }
  0x9b   :  { %111 = vst.msk [vmem:[#allocation2 + $0x6] sm:$0x1] %vm38_vm2, %v109_v45 }
  0x9d   :  { %v136_v46 = vpop.permute.xlu1 %135 }
  0x9e   :  { %138 = vst.msk [vmem:[#allocation2 + $0x5] sm:$0x1] %vm38_vm2, %v136_v46  ;;  %v127_v47 = vpop.permute.xlu0 %126 }
  0x9f   :  { %129 = vst.msk [vmem:[#allocation2 + $0x4] sm:$0x1] %vm38_vm2, %v127_v47 }
  0xa0   :  { %v176_v52 = vld [vmem:[#allocation2 + $0x8] sm:$0xff] }
  0xa1   :  { %v154_v48 = vpop.permute.xlu1 %153 }
  0xa2   :  { %156 = vst.msk [vmem:[#allocation2 + $0x3] sm:$0x1] %vm38_vm2, %v154_v48  ;;  %v145_v49 = vpop.permute.xlu0 %144 }
  0xa3   :  { %147 = vst.msk [vmem:[#allocation2 + $0x2] sm:$0x1] %vm38_vm2, %v145_v49 }
  0xa5   :  { %v172_v50 = vpop.permute.xlu1 %171 }
  0xa6   :  { %174 = vst.msk [vmem:[#allocation2 + $0x1] sm:$0x1] %vm38_vm2, %v172_v50  ;;  %v163_v51 = vpop.permute.xlu0 %162 }
  0xa7   :  { %165 = vst.msk [vmem:[#allocation2] sm:$0x1] %vm38_vm2, %v163_v51 }
  0xae   :  { %v175_v53 = vld [vmem:[#allocation2] sm:$0xff] }
  0xaf   :  { %1403 = vmatprep.mubr.msk.f32.mxu0 %vm192_vm3, %v175_v53 }
  0xb0   :  { %1404 = vmatmul.mubr.msk.f32.vlgmr.msra.gmra.mrb[0].mxu0 %vm192_vm3, %v176_v52 }
  0xb1   :  { %1524 = vmatpush3.bf16.msra.mxu0 %v1848_v23  ;;  %1436 = vmatprep.mubr.msk.f32.mxu0 %vm1697_vm1, %v1698_v35 }
  0xb2   :  { %1525 = vmatprep.subr.bf16.mxu0 %v1696_v26 }
  0xb5   :  { %1527 = vmatpush3.bf16.msra.mxu0 %v1876_v32 }
  0xb6   :  { %1534 = vmatprep.subr.bf16.mxu0 %v1696_v26 }
  0xf3   :  { %v348_v54 = vpop.f32.mrb[0].mxu1 }
  0xf4   :  { %v1416_v55 = vpop.f32.mrb[1].mxu1 }
 0x183   :  { %v1405_v57 = vpop.f32.mrb[0].mxu0 }
 0x184   :  { %v1935_v58 = vadd.f32 %v1405_v57, %v1318_v56  ;;  %v265_v59 = vpop.f32.mrb[1].mxu0 }
 0x185   :  { %v1937_v60 = vadd.f32 %v1318_v56, %v265_v59 }
 0x187   :  { %v352_v61 = vadd.f32 %v348_v54, %v1937_v60 }
 0x189   :  { %1568 = vtanh.f32 %v352_v61  ;;  %v1321_v63 = vmul.f32 -1.442695, %v352_v61 }
 0x18b   :  { %1570 = vpow2.f32 %v1321_v63 }
 0x193   :  { %v1569_v62 = vpop.eup %1568 }
 0x194   :  { %362 = vrot.lane.b32.xlu0 %v1569_v62, %s1699_s17 }
 0x195   :  { %v1571_v0 = vpop.eup %1570 }
 0x196   :  { %v356_v1 = vadd.f32 1.0, %v1571_v0 }
 0x198   :  { %1572 = vrcp.f32 %v356_v1 }
 0x1a2   :  { %v1573_v2 = vpop.eup %1572 }
 0x1a3   :  { %v360_v5 = vmul.f32 0.0, %v1573_v2 }
 0x206   :  { %v363_v3 = vpop.permute.xlu0 %362 }
 0x207   :  { %v365_v4 = vmul.f32 %v1573_v2, %v363_v3 }
 0x209   :  { %367 = vrot.lane.b32.xlu1 %v365_v4, %s1695_s22 }
 0x27b   :  { %v368_v6 = vpop.permute.xlu1 %367 }
 0x27c   :  { %v370_v7 = vadd.f32 %v368_v6, %v360_v5 }
 0x27e   :  { %1574 = vtanh.f32 %v370_v7  ;;  %v464_v24 = vrot.slane %v370_v7, 6 }
 0x288   :  { %v1575_v8 = vpop.eup %1574 }
 0x289   :  { %373 = vrot.lane.b32.xlu0 %v1575_v8, %s1699_s17 }
 0x2fb   :  { %v374_v9 = vpop.permute.xlu0 %373 }
 0x2fc   :  { %v1943_v10 = vmul.f32 %v1573_v2, %v374_v9 }
 0x2fe   :  { %378 = vrot.lane.b32.xlu1 %v1943_v10, %s1695_s22 }
 0x370   :  { %v1947_v11 = vpop.permute.xlu1 %378 }
 0x371   :  { %1426 = vmatmul.mubr.msk.f32.vlgmr.msra.gmra.mrb[2].mxu1 %vm278_vm4, %v1947_v11 }
 0x372   :  { %1530 = vmatpush3.bf16.msra.mxu1 %v1848_v23  ;;  %1447 = vmatprep.mubr.msk.f32.mxu1 %vm1697_vm1, %v1698_v35 }
 0x373   :  { %1531 = vmatprep.subr.bf16.mxu1 %v1696_v26 }
 0x376   :  { %1533 = vmatpush3.bf16.msra.mxu1 %v1876_v32 }
 0x377   :  { %1540 = vmatprep.subr.bf16.mxu1 %v1696_v26 }
 0x444   :  { %v448_v12 = vpop.f32.mrb[2].mxu1 }
 0x445   :  { %v453_v13 = vrot.slane %v448_v12, 6  ;;  %v1427_v14 = vpop.f32.mrb[3].mxu1 }
 0x447   :  { %v455_v15 = vadd.f32 %v453_v13, %v1937_v60 }
 0x449   :  { %1576 = vtanh.f32 %v455_v15  ;;  %v1323_v17 = vmul.f32 -1.442695, %v455_v15 }
 0x44b   :  { %1578 = vpow2.f32 %v1323_v17 }
 0x453   :  { %v1577_v16 = vpop.eup %1576 }
 0x454   :  { %468 = vrot.lane.b32.xlu0 %v1577_v16, %s1699_s17 }
 0x455   :  { %v1579_v18 = vpop.eup %1578 }
 0x456   :  { %v459_v19 = vadd.f32 1.0, %v1579_v18 }
 0x458   :  { %1580 = vrcp.f32 %v459_v19 }
 0x462   :  { %v1581_v20 = vpop.eup %1580 }
 0x463   :  { %v466_v25 = vmul.f32 %v1581_v20, %v464_v24 }
 0x4c6   :  { %v469_v21 = vpop.permute.xlu0 %468 }
 0x4c7   :  { %v471_v22 = vmul.f32 %v1581_v20, %v469_v21 }
 0x4c9   :  { %473 = vrot.lane.b32.xlu1 %v471_v22, %s1695_s22 }
 0x53b   :  { %v474_v27 = vpop.permute.xlu1 %473 }
 0x53c   :  { %v476_v28 = vadd.f32 %v474_v27, %v466_v25 }
 0x53e   :  { %1582 = vtanh.f32 %v476_v28  ;;  %v571_v47 = vrot.slane %v476_v28, 6 }
 0x548   :  { %v1583_v29 = vpop.eup %1582 }
 0x549   :  { %479 = vrot.lane.b32.xlu0 %v1583_v29, %s1699_s17 }
 0x5bb   :  { %v480_v30 = vpop.permute.xlu0 %479 }
 0x5bc   :  { %v1961_v31 = vmul.f32 %v1581_v20, %v480_v30 }
 0x5be   :  { %v484_v33 = vrot.slane %v1961_v31, 2 }
 0x5c0   :  { %485 = vrot.lane.b32.xlu1 %v484_v33, %s1695_s22 }
 0x632   :  { %v486_v34 = vpop.permute.xlu1 %485 }
 0x633   :  { %1437 = vmatmul.mubr.msk.f32.vlgmr.msra.gmra.mrb[2].mxu0 %vm278_vm4, %v486_v34 }
 0x634   :  { %1536 = vmatpush3.bf16.msra.mxu0 %v1848_v23  ;;  %1458 = vmatprep.mubr.msk.f32.mxu0 %vm1697_vm1, %v1698_v35 }
 0x635   :  { %1537 = vmatprep.subr.bf16.mxu0 %v1696_v26 }
 0x638   :  { %1539 = vmatpush3.bf16.msra.mxu0 %v1876_v32 }
 0x639   :  { %1546 = vmatprep.subr.bf16.mxu0 %v1696_v26 }
 0x706   :  { %v555_v36 = vpop.f32.mrb[2].mxu0 }
 0x707   :  { %v560_v37 = vrot.slane %v555_v36, 4  ;;  %v1438_v38 = vpop.f32.mrb[3].mxu0 }
 0x709   :  { %v562_v39 = vadd.f32 %v560_v37, %v1937_v60 }
 0x70b   :  { %1584 = vtanh.f32 %v562_v39  ;;  %v1325_v41 = vmul.f32 -1.442695, %v562_v39 }
 0x70d   :  { %1586 = vpow2.f32 %v1325_v41 }
 0x715   :  { %v1585_v40 = vpop.eup %1584 }
 0x716   :  { %575 = vrot.lane.b32.xlu0 %v1585_v40, %s1699_s17 }
 0x717   :  { %v1587_v42 = vpop.eup %1586 }
 0x718   :  { %v566_v43 = vadd.f32 1.0, %v1587_v42 }
 0x71a   :  { %1588 = vrcp.f32 %v566_v43 }
 0x724   :  { %v1589_v44 = vpop.eup %1588 }
 0x725   :  { %v573_v48 = vmul.f32 %v1589_v44, %v571_v47 }
 0x788   :  { %v576_v45 = vpop.permute.xlu0 %575 }
 0x789   :  { %v578_v46 = vmul.f32 %v1589_v44, %v576_v45 }
 0x78b   :  { %580 = vrot.lane.b32.xlu1 %v578_v46, %s1695_s22 }
 0x7fd   :  { %v581_v49 = vpop.permute.xlu1 %580 }
 0x7fe   :  { %v583_v50 = vadd.f32 %v581_v49, %v573_v48 }
 0x800   :  { %1590 = vtanh.f32 %v583_v50  ;;  %v678_v5 = vrot.slane %v583_v50, 6 }
 0x80a   :  { %v1591_v51 = vpop.eup %1590 }
 0x80b   :  { %586 = vrot.lane.b32.xlu0 %v1591_v51, %s1699_s17 }
 0x87d   :  { %v587_v52 = vpop.permute.xlu0 %586 }
 0x87e   :  { %v1976_v53 = vmul.f32 %v1589_v44, %v587_v52 }
 0x880   :  { %v591_v54 = vrot.slane %v1976_v53, 4 }
 0x882   :  { %592 = vrot.lane.b32.xlu1 %v591_v54, %s1695_s22 }
 0x8f4   :  { %v593_v55 = vpop.permute.xlu1 %592 }
 0x8f5   :  { %1448 = vmatmul.mubr.msk.f32.vlgmr.msra.gmra.mrb[4].mxu1 %vm278_vm4, %v593_v55 }
 0x8f6   :  { %1542 = vmatpush3.bf16.msra.mxu1 %v1848_v23  ;;  %1469 = vmatprep.mubr.msk.f32.mxu1 %vm1697_vm1, %v1698_v35 }
 0x8f7   :  { %1543 = vmatprep.subr.bf16.mxu1 %v1696_v26 }
 0x8fa   :  { %1545 = vmatpush3.bf16.msra.mxu1 %v1876_v32 }
 0x8fb   :  { %1552 = vmatprep.subr.bf16.mxu1 %v1696_v26 }
 0x9c8   :  { %v662_v56 = vpop.f32.mrb[4].mxu1 }
 0x9c9   :  { %v667_v57 = vrot.slane %v662_v56, 2  ;;  %v1449_v59 = vpop.f32.mrb[5].mxu1 }
 0x9cb   :  { %v669_v61 = vadd.f32 %v667_v57, %v1937_v60 }
 0x9cd   :  { %1592 = vtanh.f32 %v669_v61  ;;  %v1327_v63 = vmul.f32 -1.442695, %v669_v61 }
 0x9cf   :  { %1594 = vpow2.f32 %v1327_v63 }
 0x9d7   :  { %v1593_v62 = vpop.eup %1592 }
 0x9d8   :  { %682 = vrot.lane.b32.xlu0 %v1593_v62, %s1699_s17 }
 0x9d9   :  { %v1595_v0 = vpop.eup %1594 }
 0x9da   :  { %v673_v1 = vadd.f32 1.0, %v1595_v0 }
 0x9dc   :  { %1596 = vrcp.f32 %v673_v1 }
 0x9e6   :  { %v1597_v2 = vpop.eup %1596 }
 0x9e7   :  { %v680_v6 = vmul.f32 %v1597_v2, %v678_v5 }
 0xa4a   :  { %v683_v3 = vpop.permute.xlu0 %682 }
 0xa4b   :  { %v685_v4 = vmul.f32 %v1597_v2, %v683_v3 }
 0xa4d   :  { %687 = vrot.lane.b32.xlu1 %v685_v4, %s1695_s22 }
 0xabf   :  { %v688_v7 = vpop.permute.xlu1 %687 }
 0xac0   :  { %v690_v8 = vadd.f32 %v688_v7, %v680_v6 }
 0xac2   :  { %1598 = vtanh.f32 %v690_v8  ;;  %v782_v27 = vrot.slane %v690_v8, 6 }
 0xacc   :  { %v1599_v60 = vpop.eup %1598 }
 0xacd   :  { %693 = vrot.lane.b32.xlu0 %v1599_v60, %s1699_s17 }
 0xb3f   :  { %v694_v9 = vpop.permute.xlu0 %693 }
 0xb40   :  { %v1991_v12 = vmul.f32 %v1597_v2, %v694_v9 }
 0xb42   :  { %v698_v13 = vrot.slane %v1991_v12, 6 }
 0xb44   :  { %699 = vrot.lane.b32.xlu1 %v698_v13, %s1695_s22 }
 0xbb6   :  { %v1995_v14 = vpop.permute.xlu1 %699 }
 0xbb7   :  { %1459 = vmatmul.mubr.msk.f32.vlgmr.msra.gmra.mrb[4].mxu0 %vm278_vm4, %v1995_v14 }
 0xbb8   :  { %1548 = vmatpush3.bf16.msra.mxu0 %v1848_v23  ;;  %1480 = vmatprep.mubr.msk.f32.mxu0 %vm1697_vm1, %v1698_v35 }
 0xbb9   :  { %1549 = vmatprep.subr.bf16.mxu0 %v1696_v26 }
 0xbbc   :  { %1551 = vmatpush3.bf16.msra.mxu0 %v1876_v32 }
 0xc8a   :  { %v769_v15 = vpop.f32.mrb[4].mxu0 }
 0xc8b   :  { %v773_v16 = vadd.f32 %v769_v15, %v1935_v58  ;;  %v1460_v17 = vpop.f32.mrb[5].mxu0 }
 0xc8d   :  { %1600 = vtanh.f32 %v773_v16  ;;  %v1329_v19 = vmul.f32 -1.442695, %v773_v16 }
 0xc8f   :  { %1602 = vpow2.f32 %v1329_v19 }
 0xc97   :  { %v1601_v18 = vpop.eup %1600 }
 0xc98   :  { %786 = vrot.lane.b32.xlu0 %v1601_v18, %s1699_s17 }
 0xc99   :  { %v1603_v20 = vpop.eup %1602 }
 0xc9a   :  { %v777_v21 = vadd.f32 1.0, %v1603_v20 }
 0xc9c   :  { %1604 = vrcp.f32 %v777_v21 }
 0xca6   :  { %v1605_v22 = vpop.eup %1604 }
 0xca7   :  { %v784_v28 = vmul.f32 %v1605_v22, %v782_v27 }
 0xd0a   :  { %v787_v24 = vpop.permute.xlu0 %786 }
 0xd0b   :  { %v789_v25 = vmul.f32 %v1605_v22, %v787_v24 }
 0xd0d   :  { %791 = vrot.lane.b32.xlu1 %v789_v25, %s1695_s22 }
 0xd7f   :  { %v792_v29 = vpop.permute.xlu1 %791 }
 0xd80   :  { %v794_v30 = vadd.f32 %v792_v29, %v784_v28 }
 0xd82   :  { %1606 = vtanh.f32 %v794_v30 }
 0xd8c   :  { %v1607_v33 = vpop.eup %1606 }
 0xd8d   :  { %797 = vrot.lane.b32.xlu0 %v1607_v33, %s1699_s17 }
 0xdff   :  { %v798_v34 = vpop.permute.xlu0 %797 }
 0xe00   :  { %v2008_v36 = vmul.f32 %v1605_v22, %v798_v34 }
 0xe02   :  { %802 = vrot.lane.b32.xlu1 %v2008_v36, %s1695_s22 }
 0xe74   :  { %v2012_v37 = vpop.permute.xlu1 %802 }
 0xe75   :  { %1470 = vmatmul.mubr.msk.f32.vlgmr.msra.gmra.mrb[6].mxu1 %vm278_vm4, %v2012_v37 }
 0xe76   :  { %1554 = vmatpush3.bf16.msra.mxu1 %v1848_v23  ;;  %1491 = vmatprep.mubr.msk.f32.mxu1 %vm1697_vm1, %v1698_v35 }
 0xe77   :  { %1555 = vmatprep.subr.bf16.mxu1 %v1696_v26  ;;  %v888_v26 = vrot.slane %v794_v30, 6 }
 0xe7a   :  { %1557 = vmatpush3.bf16.msra.mxu1 %v1876_v32 }
 0xf48   :  { %v872_v38 = vpop.f32.mrb[6].mxu1 }
 0xf49   :  { %v877_v39 = vrot.slane %v872_v38, 6  ;;  %v1471_v40 = vpop.f32.mrb[7].mxu1 }
 0xf4b   :  { %v879_v41 = vadd.f32 %v877_v39, %v1935_v58  ;;  %v1159_v39 = vrot.slane %v1976_v53, 2 }
 0xf4d   :  { %1608 = vtanh.f32 %v879_v41  ;;  %v1331_v43 = vmul.f32 -1.442695, %v879_v41  ;;  %v1148_v41 = vrot.slane %v2008_v36, 2 }
 0xf4f   :  { %1610 = vpow2.f32 %v1331_v43 }
 0xf57   :  { %v1609_v42 = vpop.eup %1608 }
 0xf58   :  { %892 = vrot.lane.b32.xlu0 %v1609_v42, %s1699_s17  ;;  %v1175_v42 = vrot.slane %v1943_v10, 2 }
 0xf59   :  { %v1611_v44 = vpop.eup %1610 }
 0xf5a   :  { %v883_v23 = vadd.f32 1.0, %v1611_v44 }
 0xf5c   :  { %1612 = vrcp.f32 %v883_v23 }
 0xf66   :  { %v1613_v45 = vpop.eup %1612 }
 0xf67   :  { %v890_v32 = vmul.f32 %v1613_v45, %v888_v26 }
 0xfca   :  { %v893_v35 = vpop.permute.xlu0 %892 }
 0xfcb   :  { %v895_v46 = vmul.f32 %v1613_v45, %v893_v35 }
 0xfcd   :  { %897 = vrot.lane.b32.xlu1 %v895_v46, %s1695_s22 }
0x103f   :  { %v898_v47 = vpop.permute.xlu1 %897 }
0x1040   :  { %v900_v48 = vadd.f32 %v898_v47, %v890_v32 }
0x1042   :  { %1614 = vtanh.f32 %v900_v48  ;;  %v995_v4 = vrot.slane %v900_v48, 6 }
0x104c   :  { %v1615_v49 = vpop.eup %1614 }
0x104d   :  { %903 = vrot.lane.b32.xlu0 %v1615_v49, %s1699_s17 }
0x10bf   :  { %v904_v50 = vpop.permute.xlu0 %903 }
0x10c0   :  { %v2025_v51 = vmul.f32 %v1613_v45, %v904_v50 }
0x10c2   :  { %v908_v52 = vrot.slane %v2025_v51, 2  ;;  %v1140_v40 = vrot.slane %v2025_v51, 6 }
0x10c4   :  { %909 = vrot.lane.b32.xlu1 %v908_v52, %s1695_s22 }
0x1136   :  { %v910_v54 = vpop.permute.xlu1 %909 }
0x1137   :  { %1481 = vmatmul.mubr.msk.f32.vlgmr.msra.gmra.mrb[6].mxu0 %vm278_vm4, %v910_v54 }
0x120a   :  { %v979_v55 = vpop.f32.mrb[6].mxu0 }
0x120b   :  { %v984_v56 = vrot.slane %v979_v55, 4  ;;  %v1482_v57 = vpop.f32.mrb[7].mxu0 }
0x120d   :  { %v986_v59 = vadd.f32 %v984_v56, %v1935_v58 }
0x120f   :  { %1616 = vtanh.f32 %v986_v59  ;;  %v1333_v62 = vmul.f32 -1.442695, %v986_v59 }
0x1211   :  { %1618 = vpow2.f32 %v1333_v62 }
0x1219   :  { %v1617_v61 = vpop.eup %1616 }
0x121a   :  { %999 = vrot.lane.b32.xlu0 %v1617_v61, %s1699_s17 }
0x121b   :  { %v1619_v63 = vpop.eup %1618 }
0x121c   :  { %v990_v0 = vadd.f32 1.0, %v1619_v63 }
0x121e   :  { %1620 = vrcp.f32 %v990_v0 }
0x1228   :  { %v1621_v1 = vpop.eup %1620 }
0x1229   :  { %v997_v5 = vmul.f32 %v1621_v1, %v995_v4 }
0x128c   :  { %v1000_v2 = vpop.permute.xlu0 %999 }
0x128d   :  { %v1002_v3 = vmul.f32 %v1621_v1, %v1000_v2 }
0x128f   :  { %1004 = vrot.lane.b32.xlu1 %v1002_v3, %s1695_s22 }
0x1301   :  { %v1005_v6 = vpop.permute.xlu1 %1004 }
0x1302   :  { %v1007_v7 = vadd.f32 %v1005_v6, %v997_v5 }
0x1304   :  { %1622 = vtanh.f32 %v1007_v7 }
0x130e   :  { %v1623_v8 = vpop.eup %1622 }
0x130f   :  { %1010 = vrot.lane.b32.xlu0 %v1623_v8, %s1699_s17 }
0x1381   :  { %v1011_v60 = vpop.permute.xlu0 %1010 }
0x1382   :  { %v1013_v9 = vmul.f32 %v1621_v1, %v1011_v60 }
0x1384   :  { %v1015_v13 = vrot.slane %v1013_v9, 4  ;;  %v1132_v38 = vrot.slane %v1013_v9, 2 }
0x1386   :  { %1016 = vrot.lane.b32.xlu1 %v1015_v13, %s1695_s22 }
0x13f8   :  { %v1017_v15 = vpop.permute.xlu1 %1016 }
0x13f9   :  { %1492 = vmatmul.mubr.msk.f32.vlgmr.msra.gmra.mrb[8].mxu1 %vm278_vm4, %v1017_v15 }
0x14cc   :  { %v1086_v16 = vpop.f32.mrb[8].mxu1 }
0x14cd   :  { %v1091_v17 = vrot.slane %v1086_v16, 2  ;;  %v1493_v18 = vpop.f32.mrb[9].mxu1 }
0x14ce   :  { %v1155_v18 = vsel %vm1127_vm5, %v2012_v37, %v1995_v14 }
0x14cf   :  { %v1093_v19 = vadd.f32 %v1091_v17, %v1935_v58  ;;  %v1102_v58 = vrot.slane %v1007_v7, 6 }
0x14d1   :  { %1624 = vtanh.f32 %v1093_v19  ;;  %v1335_v21 = vmul.f32 -1.442695, %v1093_v19 }
0x14d3   :  { %1626 = vpow2.f32 %v1335_v21 }
0x14db   :  { %v1625_v20 = vpop.eup %1624 }
0x14dc   :  { %1106 = vrot.lane.b32.xlu0 %v1625_v20, %s1699_s17 }
0x14dd   :  { %v1627_v22 = vpop.eup %1626 }
0x14de   :  { %v1097_v24 = vadd.f32 1.0, %v1627_v22 }
0x14e0   :  { %1628 = vrcp.f32 %v1097_v24 }
0x14ea   :  { %v1629_v25 = vpop.eup %1628 }
0x14eb   :  { %v1104_v29 = vmul.f32 %v1629_v25, %v1102_v58 }
0x154e   :  { %v1107_v27 = vpop.permute.xlu0 %1106 }
0x154f   :  { %v1109_v28 = vmul.f32 %v1629_v25, %v1107_v27 }
0x1551   :  { %1111 = vrot.lane.b32.xlu1 %v1109_v28, %s1695_s22 }
0x1555   :  { %1129 = vrot.lane.b32.xlu1 %v1961_v31, %s1695_s22 }
0x1559   :  { %1156 = vrot.lane.b32.xlu1 %v2025_v51, %s1695_s22 }
0x155d   :  { %1137 = vrot.lane.b32.xlu1 %v1976_v53, %s1695_s22 }
0x1561   :  { %1164 = vrot.lane.b32.xlu1 %v1013_v9, %s1695_s22 }
0x1565   :  { %1145 = vrot.lane.b32.xlu1 %v1991_v12, %s1695_s22  ;;  %v1167_v12 = vrot.slane %v1961_v31, 6 }
0x15c3   :  { %v1112_v30 = vpop.permute.xlu1 %1111 }
0x15c4   :  { %v2048_v33 = vadd.f32 %v1112_v30, %v1104_v29 }
0x15c6   :  { %1630 = vtanh.f32 %v2048_v33  ;;  %v1245_v53 = vrot.slane %v2048_v33, 4  ;;  %v1243_v5 = vrot.slane %v2048_v33, 6 }
0x15c7   :  { %v1130_v43 = vpop.permute.xlu1 %1129 }
0x15cb   :  { %v1157_v45 = vpop.permute.xlu1 %1156 }
0x15cf   :  { %v1138_v10 = vpop.permute.xlu1 %1137 }
0x15d0   :  { %v1631_v34 = vpop.eup %1630 }
0x15d1   :  { %1117 = vrot.lane.b32.xlu0 %v1631_v34, %s1699_s17 }
0x15d3   :  { %v1165_v50 = vpop.permute.xlu1 %1164 }
0x15d5   :  { %1133 = vrot.lane.b32.xlu0 %v1132_v38, %s1695_s22 }
0x15d7   :  { %v1146_v56 = vpop.permute.xlu1 %1145 }
0x15d9   :  { %1160 = vrot.lane.b32.xlu0 %v1159_v39, %s1695_s22 }
0x15dd   :  { %1141 = vrot.lane.b32.xlu0 %v1140_v40, %s1695_s22 }
0x15e1   :  { %1168 = vrot.lane.b32.xlu0 %v1167_v12, %s1695_s22 }
0x15e5   :  { %1149 = vrot.lane.b32.xlu0 %v1148_v41, %s1695_s22 }
0x15e9   :  { %1176 = vrot.lane.b32.xlu0 %v1175_v42, %s1695_s22 }
0x15ed   :  { %1246 = vrot.lane.b32.xlu0 %v1245_v53, %s1700_s4 }
0x1643   :  { %v1118_v44 = vpop.permute.xlu0 %1117 }
0x1644   :  { %v1120_v23 = vmul.f32 %v1629_v25, %v1118_v44 }
0x1646   :  { %1172 = vrot.lane.b32.xlu1 %v1120_v23, %s1695_s22  ;;  %v1230_v35 = vrot.slane %v1120_v23, 4  ;;  %v1123_v62 = vrot.slane %v1120_v23, 6 }
0x1647   :  { %v1134_v31 = vpop.permute.xlu0 %1133 }
0x1648   :  { %v1136_v36 = vsel %vm1127_vm5, %v1130_v43, %v1134_v31 }
0x1649   :  { %v1181_v46 = vrot.slane %v1136_v36, 2 }
0x164a   :  { %1231 = vrot.lane.b32.xlu1 %v1230_v35, %s1700_s4 }
0x164b   :  { %v1161_v26 = vpop.permute.xlu0 %1160  ;;  %1182 = vrot.lane.b32.xlu0 %v1181_v46, %s1695_s22 }
0x164c   :  { %v1163_v32 = vsel %vm1127_vm5, %v1157_v45, %v1161_v26 }
0x164d   :  { %v1196_v47 = vrot.slane %v1163_v32, 2 }
0x164f   :  { %1197 = vrot.lane.b32.xlu1 %v1196_v47, %s1695_s22  ;;  %v1142_v48 = vpop.permute.xlu0 %1141 }
0x1650   :  { %v1144_v49 = vsel %vm1127_vm5, %v1138_v10, %v1142_v48 }
0x1651   :  { %v1186_v51 = vrot.slane %v1144_v49, 4 }
0x1653   :  { %v1169_v52 = vpop.permute.xlu0 %1168  ;;  %1187 = vrot.lane.b32.xlu0 %v1186_v51, %s1699_s17 }
0x1654   :  { %v1171_v54 = vsel %vm1127_vm5, %v1165_v50, %v1169_v52 }
0x1655   :  { %v1201_v55 = vrot.slane %v1171_v54, 4 }
0x1657   :  { %1202 = vrot.lane.b32.xlu1 %v1201_v55, %s1699_s17  ;;  %v1150_v57 = vpop.permute.xlu0 %1149 }
0x1658   :  { %v1152_v59 = vsel %vm1127_vm5, %v1146_v56, %v1150_v57 }
0x1659   :  { %v1191_v61 = vrot.slane %v1152_v59, 6 }
0x165b   :  { %1124 = vrot.lane.b32.xlu1 %v1123_v62, %s1695_s22  ;;  %1192 = vrot.lane.b32.xlu0 %v1191_v61, %s1701_s25  ;;  %v1177_v63 = vpop.permute.xlu0 %1176 }
0x165f   :  { %v1247_v3 = vpop.permute.xlu0 %1246 }
0x1660   :  { %v1249_v7 = vsel %vm1234_vm6, %v1243_v5, %v1247_v3 }
0x16b8   :  { %v1173_v0 = vpop.permute.xlu1 %1172 }
0x16b9   :  { %v1179_v1 = vsel %vm1127_vm5, %v1173_v0, %v1177_v63 }
0x16ba   :  { %v1206_v2 = vrot.slane %v1179_v1, 6 }
0x16bc   :  { %v1232_v4 = vpop.permute.xlu1 %1231  ;;  %1207 = vrot.lane.b32.xlu1 %v1206_v2, %s1701_s25 }
0x16bd   :  { %v1235_v6 = vsel %vm1234_vm6, %v1123_v62, %v1232_v4  ;;  %v1183_v13 = vpop.permute.xlu0 %1182 }
0x16be   :  { %1237 = vrot.lane.b32.xlu0 %v1235_v6, %s1695_s22  ;;  %s1702_s22 = smov [#allocation5]  }
0x16bf   :  { %s1263_s28 = sshll.u32 %s1702_s22, 4  ;;  %s1264_s28 = int_to_ptr.vmem [resolvable:$true] %s1263_s28 }
0x16c0   :  { %1251 = vrot.lane.b32.xlu1 %v1249_v7, %s1701_s25  ;;  %s1644_s13 = scalar_lea.vmem %s1264_s28, 64  ;;  %p1649_p6 = scmp.lt.s32.totalorder %s1264_s28, %s1264_s28 }
0x16c1   :  { %v1198_v8 = vpop.permute.xlu1 %1197  ;;  %p1645_p5 = scmp.ne.s32.totalorder %s1264_s28, %s1644_s13  ;;  %p1650_p7 = scmp.lt.s32.totalorder %s1644_s13, %s1644_s13 }
0x16c2   :  { %v1214_v21 = vsel %vm278_vm4, %v1155_v18, %v1198_v8 }
0x16c3   :  { %p1651_p8 = por %p1650_p7, %p1649_p6 }
0x16c5   :  { %v1188_v16 = vpop.permute.xlu0 %1187  ;;  %p1652_p9 = pnand %p1651_p8, %p1645_p5 }
0x16c9   :  { %v1203_v60 = vpop.permute.xlu1 %1202 }
0x16ca   :  { %v1215_v22 = vsel %vm192_vm3, %v1214_v21, %v1203_v60 }
0x16cd   :  { %v1125_v9 = vpop.permute.xlu1 %1124  ;;  %v1193_v20 = vpop.permute.xlu0 %1192 }
0x16ce   :  { %v1128_v15 = vsel %vm1127_vm5, %v1947_v11, %v1125_v9 }
0x16cf   :  { %v1210_v17 = vsel %vm278_vm4, %v1128_v15, %v1183_v13 }
0x16d0   :  { %v1211_v19 = vsel %vm192_vm3, %v1210_v17, %v1188_v16 }
0x16d1   :  { %v1213_v11 = vsel %vm1212_vm7, %v1211_v19, %v1193_v20 }
0x172e   :  { %v1208_v24 = vpop.permute.xlu1 %1207 }
0x172f   :  { %v1216_v25 = vsel %vm1212_vm7, %v1215_v22, %v1208_v24 }
0x1730   :  { %v1219_v27 = vcombine.low %v1213_v11, %v1216_v25  ;;  %v1238_v28 = vpop.permute.xlu0 %1237 }
0x1731   :  { %1241 = vst.msk [vmem:[#allocation5] sm:$0xf] %vm1240_vm8, %v1238_v28 }
0x1732   :  { %1336 = vst.sshfl [vmem:[%s2128_s5] sm:$0x33 pattern:$0x76325410] %v1219_v27  ;;  %v1252_v14 = vpop.permute.xlu1 %1251 }
0x1733   :  { %1655 = shalt.err (!%p1652_p9)
}
0x1734   :  { %s1656_s15 = scalar_lea.hbm %s2129_s6, 64 }
0x1735   :  { %p1657_p10 = scmp.ne.s32.totalorder %s2129_s6, %s1656_s15  ;;  %p1660_p11 = scmp.lt.u32.totalorder %s1656_s15, %s2129_s6 }
0x1737   :  { %p1662_p12 = pnand %p1660_p11, %p1657_p10 }
0x1739   :  { %1665 = shalt.err (!%p1662_p12)
}
0x173a   :  { %1266 = dma.vmem_to_hbm [thread:$0]  %s1264_s28, 64, %s2129_s6, [#allocation6]   ;;  %1254 = vst.msk [vmem:[#allocation7] sm:$0xf] %vm1240_vm8, %v1252_v14 }
0x173b   :  { %s1666_s19 = scalar_lea.vmem %s2088_s30, 64  ;;  %p1671_p0 = scmp.lt.s32.totalorder %s2088_s30, %s2088_s30 }
0x173c   :  { %p1667_p13 = scmp.ne.s32.totalorder %s2088_s30, %s1666_s19  ;;  %p1672_p1 = scmp.lt.s32.totalorder %s1666_s19, %s1666_s19 }
0x173e   :  { %p1673_p2 = por %p1672_p1, %p1671_p0 }
0x1740   :  { %p1674_p3 = pnand %p1673_p2, %p1667_p13 }
0x1742   :  { %1677 = shalt.err (!%p1674_p3)
}
0x1743   :  { %s1678_s20 = scalar_lea.hbm %s2130_s7, 64 }
0x1744   :  { %p1679_p4 = scmp.ne.s32.totalorder %s2130_s7, %s1678_s20  ;;  %p1682_p5 = scmp.lt.u32.totalorder %s1678_s20, %s2130_s7 }
0x1746   :  { %p1684_p6 = pnand %p1682_p5, %p1679_p4 }
0x1748   :  { %1687 = shalt.err (!%p1684_p6)
}
0x1749   :  { %1276 = dma.vmem_to_hbm [thread:$0]  %s2088_s30, 64, %s2130_s7, [#allocation8]  }
0x174a   :  { %1690 = dma.done.wait [#allocation6], 64  }
0x174b   :  { %1691 = vsyncadd [#allocation6], 4294967232 }
0x174c   :  { %1692 = dma.done.wait [#allocation8], 64  }
0x174d   :  { %1693 = vsyncadd [#allocation8], 4294967232 }
0x174e   :  { %1285 = vsyncpa [#allocation6], 1 }
0x174f   :  { %1286 = vsyncpa [#allocation8], 1 }

</bundles_post_ra>
